<compile_context>
chip_gen: v6e
topology: v6e:2x2x1
jax: 0.10.0
libtpu: 0.0.40
codegen_flags: <defaults>
</compile_context>

<pallas_src>
import jax
import jax.numpy as jnp
from jax import lax
from jax.experimental import pallas as pl
from jax.experimental.pallas import tpu as pltpu


# ----------------------------- small helpers --------------------------------
def _round_up(v, m):
    return (v + m - 1) // m * m


def _pick_tile_h(H, cap=8):
    th = min(H, cap)
    while H % th:
        th -= 1
    return th


# ------------------------------ Pallas kernel -------------------------------
def _bottleneck_kernel(x_ref, w1_ref, b1_ref, w2_ref, b2_ref, w3_ref, b3_ref,
                       o_ref):
    # Shapes after BlockSpec squeezing:
    #   x_ref : (H+2, WP, Cin_p)   f32   (zero-padded image, full H for this n)
    #   w1_ref: (Cin_p, Pp)        bf16  (BN1 scale folded in)
    #   b1_ref: (1, Pp)            f32
    #   w2_ref: (9, Pp, Pp)        bf16  (BN2 scale folded in)
    #   b2_ref: (1, Pp)            f32
    #   w3_ref: (Pp, Cout_p)       bf16  (BN3 scale folded in)
    #   b3_ref: (1, Cout_p)        f32
    #   o_ref : (TH, W, Cout_p)    f32
    TH, W, Co = o_ref.shape
    Hp, WP, Cin_p = x_ref.shape
    H = Hp - 2
    Pp = w1_ref.shape[-1]
    b = pl.program_id(2)

    # Row-band window with a 1-row halo on each side (padded-H coordinates).
    r0 = pl.multiple_of(b * TH, TH)
    xw = x_ref[pl.ds(r0, TH + 2), :, :]                     # (TH+2, WP, Cin_p) f32

    # ---- conv1 (1x1, scale-folded) + bias + ReLU --------------------------
    xb = xw.reshape(-1, Cin_p).astype(jnp.bfloat16)
    h1 = jnp.dot(xb, w1_ref[...], preferred_element_type=jnp.float32)
    h1 = jnp.maximum(h1 + b1_ref[...], 0.0)
    h1 = h1.reshape(TH + 2, WP, Pp)

    # conv2's zero padding applies to the conv1 *output*; the padded border of
    # the input produced relu(b1) there, so mask those positions back to zero.
    rows = r0 + lax.broadcasted_iota(jnp.int32, (TH + 2, WP, 1), 0)
    cols = lax.broadcasted_iota(jnp.int32, (TH + 2, WP, 1), 1)
    valid = (rows >= 1) & (rows <= H) & (cols >= 1) & (cols <= W)
    h1 = jnp.where(valid, h1, 0.0).astype(jnp.bfloat16)

    # ---- conv2 (3x3, pad=1, stride=1, scale-folded): 9 unrolled matmuls ---
    acc = jnp.zeros((TH * W, Pp), jnp.float32)
    for dy in range(3):
        for dx in range(3):
            tap = h1[dy:dy + TH, dx:dx + W, :].reshape(-1, Pp)
            acc = acc + jnp.dot(tap, w2_ref[3 * dy + dx],
                                preferred_element_type=jnp.float32)
    h2 = jnp.maximum(acc + b2_ref[...], 0.0).astype(jnp.bfloat16)

    # ---- conv3 (1x1, scale-folded) + bias ---------------------------------
    h3 = jnp.dot(h2, w3_ref[...], preferred_element_type=jnp.float32)
    h3 = h3 + b3_ref[...]

    # ---- residual add (interior of the padded window) + ReLU --------------
    res = xw[1:TH + 1, 1:W + 1, :Co].reshape(TH * W, Co)
    o_ref[...] = jnp.maximum(h3 + res, 0.0).reshape(TH, W, Co)


# ------------------------------ wrappers -------------------------------------
def pack_params(params, num_parallel):
    """Fold per-stream BN scale into shared conv weights, pad channels to 128,
    cast matmul operands to bf16.  Returns stacked per-stream tensors."""
    w1, w2, w3 = params['w1'], params['w2'], params['w3']
    Cin, P = w1.shape
    Cout = w3.shape[1]
    Cin_p = _round_up(Cin, 128)
    Pp = _round_up(P, 128)
    Cout_p = _round_up(Cout, 128)

    def pad2(w, r, c):
        return jnp.zeros((r, c), jnp.float32).at[:w.shape[0], :w.shape[1]].set(w)

    w1s, w2s, w3s, b1s, b2s, b3s = [], [], [], [], [], []
    for l in range(num_parallel):
        s1, b1 = params['bn1'][l]
        s2, b2 = params['bn2'][l]
        s3, b3 = params['bn3'][l]
        w1f = w1 * s1[None, :]
        w2f = (w2 * s2[None, None, None, :]).reshape(9, P, P)
        w3f = w3 * s3[None, :]
        w1s.append(pad2(w1f, Cin_p, Pp))
        w2s.append(jnp.stack([pad2(w2f[t], Pp, Pp) for t in range(9)]))
        w3s.append(pad2(w3f, Pp, Cout_p))
        b1s.append(jnp.zeros((1, Pp), jnp.float32).at[0, :P].set(b1))
        b2s.append(jnp.zeros((1, Pp), jnp.float32).at[0, :P].set(b2))
        b3s.append(jnp.zeros((1, Cout_p), jnp.float32).at[0, :Cout].set(b3))

    return (jnp.stack(w1s).astype(jnp.bfloat16), jnp.stack(b1s),
            jnp.stack(w2s).astype(jnp.bfloat16), jnp.stack(b2s),
            jnp.stack(w3s).astype(jnp.bfloat16), jnp.stack(b3s))


def pack_inputs(x_parallel_nchw, Cin_p):
    """Stack streams, NCHW -> NHWC, zero-pad H/W by 1 and channels to Cin_p."""
    x = jnp.stack(x_parallel_nchw)                    # (L, N, C, H, W)
    x = jnp.transpose(x, (0, 1, 3, 4, 2))             # (L, N, H, W, C)
    L, N, H, W, C = x.shape
    WP = _round_up(W + 2, 8)                          # keep sublane dim aligned
    xp = jnp.zeros((L, N, H + 2, WP, Cin_p), jnp.float32)
    xp = xp.at[:, :, 1:H + 1, 1:W + 1, :C].set(x)
    return xp, (L, N, H, W, C)


def bottleneck_forward(x_parallel_nchw, params, tile_h=None):
    """Bottleneck.forward: list of NCHW tensors in, list of NCHW tensors out."""
    num_parallel = len(x_parallel_nchw)
    assert params['w1'].shape[0] == params['w3'].shape[1], (
        "residual add requires inplanes == 4*planes (downsample not implemented)")

    w1p, b1p, w2p, b2p, w3p, b3p = pack_params(params, num_parallel)
    Cin_p, Pp = w1p.shape[1], w1p.shape[2]
    Cout_p = w3p.shape[2]
    Cout = params['w3'].shape[1]

    xp, (L, N, H, W, _) = pack_inputs(x_parallel_nchw, Cin_p)
    WP = xp.shape[3]
    TH = tile_h or _pick_tile_h(H)
    NB = H // TH

    flops = 2 * L * N * H * W * (Cin_p * Pp + 9 * Pp * Pp + Pp * Cout_p)
    bytes_accessed = int(xp.size * 4 + L * N * H * W * Cout_p * 4
                         + (w1p.size + w2p.size + w3p.size) * 2
                         + (b1p.size + b2p.size + b3p.size) * 4)

    out_padded = pl.pallas_call(
        _bottleneck_kernel,
        out_shape=jax.ShapeDtypeStruct((L, N, H, W, Cout_p), jnp.float32),
        grid=(L, N, NB),
        in_specs=[
            # image block is resident across the row-band axis (same block idx)
            pl.BlockSpec((None, None, H + 2, WP, Cin_p),
                         lambda l, n, b: (l, n, 0, 0, 0)),
            pl.BlockSpec((None, Cin_p, Pp), lambda l, n, b: (l, 0, 0)),
            pl.BlockSpec((None, 1, Pp), lambda l, n, b: (l, 0, 0)),
            pl.BlockSpec((None, 9, Pp, Pp), lambda l, n, b: (l, 0, 0, 0)),
            pl.BlockSpec((None, 1, Pp), lambda l, n, b: (l, 0, 0)),
            pl.BlockSpec((None, Pp, Cout_p), lambda l, n, b: (l, 0, 0)),
            pl.BlockSpec((None, 1, Cout_p), lambda l, n, b: (l, 0, 0)),
        ],
        out_specs=pl.BlockSpec((None, None, TH, W, Cout_p),
                               lambda l, n, b: (l, n, b, 0, 0)),
        compiler_params=pltpu.CompilerParams(
            dimension_semantics=("parallel", "parallel", "arbitrary"),
            vmem_limit_bytes=32 * 1024 * 1024),
        cost_estimate=pl.CostEstimate(flops=int(flops), transcendentals=0,
                                      bytes_accessed=bytes_accessed),
    )(xp, w1p, b1p, w2p, b2p, w3p, b3p)

    out = out_padded[..., :Cout]                       # strip channel padding
    out = jnp.transpose(out, (0, 1, 4, 2, 3))          # back to NCHW
    return [out[l] for l in range(L)]


# ----------------------- plain-JAX reference (for checking) ------------------
def reference_stream_nchw(x, w1, s1, b1, w2, s2, b2, w3, s3, b3):
    dn = ('NCHW', 'HWIO', 'NCHW')

    def bn(h, s, bb):
        return h * s.reshape(1, -1, 1, 1) + bb.reshape(1, -1, 1, 1)

    h = lax.conv_general_dilated(x, w1.reshape(1, 1, *w1.shape), (1, 1),
                                 'VALID', dimension_numbers=dn)
    h = jax.nn.relu(bn(h, s1, b1))
    h = lax.conv_general_dilated(h, w2, (1, 1), 'SAME', dimension_numbers=dn)
    h = jax.nn.relu(bn(h, s2, b2))
    h = lax.conv_general_dilated(h, w3.reshape(1, 1, *w3.shape), (1, 1),
                                 'VALID', dimension_numbers=dn)
    h = bn(h, s3, b3)
    return jax.nn.relu(h + x)


# ----------------------- deterministic parameter init ------------------------
def fold_bn(gamma, beta, mean, var, eps=1e-5):
    scale = gamma / jnp.sqrt(var + eps)
    bias = beta - mean * scale
    return scale.astype(jnp.float32), bias.astype(jnp.float32)


def init_params(key, inplanes, planes, num_parallel):
    expansion = 4
    keys = jax.random.split(key, 3 + 3 * num_parallel)
    w1 = 0.1 * jax.random.normal(keys[0], (inplanes, planes), jnp.float32)
    w2 = 0.1 * jax.random.normal(keys[1], (3, 3, planes, planes), jnp.float32)
    w3 = 0.1 * jax.random.normal(keys[2], (planes, planes * expansion),
                                 jnp.float32)

    def bn_params(k, c):
        k1, k2, k3, k4 = jax.random.split(k, 4)
        gamma = 1.0 + 0.1 * jax.random.normal(k1, (c,), jnp.float32)
        beta = 0.1 * jax.random.normal(k2, (c,), jnp.float32)
        mean = 0.1 * jax.random.normal(k3, (c,), jnp.float32)
        var = 0.5 + jax.random.uniform(k4, (c,), jnp.float32)
        return fold_bn(gamma, beta, mean, var)

    bn1 = [bn_params(keys[3 + 3 * l + 0], planes) for l in range(num_parallel)]
    bn2 = [bn_params(keys[3 + 3 * l + 1], planes) for l in range(num_parallel)]
    bn3 = [bn_params(keys[3 + 3 * l + 2], planes * expansion)
           for l in range(num_parallel)]
    return {'w1': w1, 'w2': w2, 'w3': w3, 'bn1': bn1, 'bn2': bn2, 'bn3': bn3}


if __name__ == "__main__":
    # Small shapes: N=2, inplanes=16, planes=4 (expansion 4 -> out=16), 16x16.
    N, H, W = 2, 16, 16
    inplanes, planes, num_parallel = 16, 4, 2

    key = jax.random.PRNGKey(0)
    key, kp = jax.random.split(key)
    params = init_params(kp, inplanes, planes, num_parallel)

    xkeys = jax.random.split(key, num_parallel)
    # PyTorch-layout NCHW inputs, one per parallel stream.
    x_parallel = [jax.random.normal(k, (N, inplanes, H, W), jnp.float32)
                  for k in xkeys]

    outs = bottleneck_forward(x_parallel, params)
    outs = [jax.block_until_ready(o) for o in outs]

    # correctness check against the plain-JAX reference (f32; kernel uses bf16
    # on the MXU path, hence the tolerance)
    for l, (x, o) in enumerate(zip(x_parallel, outs)):
        s1, b1 = params['bn1'][l]
        s2, b2 = params['bn2'][l]
        s3, b3 = params['bn3'][l]
        ref = reference_stream_nchw(x, params['w1'], s1, b1, params['w2'],
                                    s2, b2, params['w3'], s3, b3)
        assert o.shape == (N, planes * 4, H, W)
        err = jnp.max(jnp.abs(o - ref))
        assert jnp.allclose(o, ref, atol=3e-2, rtol=3e-2), \
            f"mismatch on stream {l}: max err {err}"

    print("KERNEL_OK")
</pallas_src>

<mosaic_0001>
module attributes {stable_mosaic.version = 11 : i64} {
  func.func @_bottleneck_kernel(%arg0: i32, %arg1: i32, %arg2: i32, %arg3: memref<1x1x18x24x128xf32, #tpu.memory_space<vmem>>, %arg4: memref<1x128x128xbf16, #tpu.memory_space<vmem>>, %arg5: memref<1x1x128xf32, #tpu.memory_space<vmem>>, %arg6: memref<1x9x128x128xbf16, #tpu.memory_space<vmem>>, %arg7: memref<1x1x128xf32, #tpu.memory_space<vmem>>, %arg8: memref<1x128x128xbf16, #tpu.memory_space<vmem>>, %arg9: memref<1x1x128xf32, #tpu.memory_space<vmem>>, %arg10: memref<1x1x8x16x128xf32, #tpu.memory_space<vmem>>) attributes {dimension_semantics = [#tpu.dimension_semantics<parallel>, #tpu.dimension_semantics<parallel>, #tpu.dimension_semantics<arbitrary>], iteration_bounds = array<i64: 2, 2, 2>, scalar_prefetch = 0 : i64, scratch_operands = 0 : i64, tpu.core_type = #tpu.core_type<tc>, window_params = [{transform_indices = @transform_0, window_bounds = array<i64: 1, 1, 18, 24, 128>}, {transform_indices = @transform_1, window_bounds = array<i64: 1, 128, 128>}, {transform_indices = @transform_2, window_bounds = array<i64: 1, 1, 128>}, {transform_indices = @transform_3, window_bounds = array<i64: 1, 9, 128, 128>}, {transform_indices = @transform_4, window_bounds = array<i64: 1, 1, 128>}, {transform_indices = @transform_5, window_bounds = array<i64: 1, 128, 128>}, {transform_indices = @transform_6, window_bounds = array<i64: 1, 1, 128>}, {transform_indices = @transform_7, window_bounds = array<i64: 1, 1, 8, 16, 128>}]} {
    %c8_i32 = arith.constant 8 : i32
    %0 = arith.muli %arg2, %c8_i32 : i32
    %1 = tpu.assume_multiple %0, 8 : i32
    %c0 = arith.constant 0 : index
    %c0_0 = arith.constant 0 : index
    %2 = arith.index_cast %1 : i32 to index
    %c0_1 = arith.constant 0 : index
    %c0_2 = arith.constant 0 : index
    %3 = vector.load %arg3[%c0, %c0_0, %2, %c0_1, %c0_2] : memref<1x1x18x24x128xf32, #tpu.memory_space<vmem>>, vector<1x1x10x24x128xf32>
    %4 = vector.shape_cast %3 : vector<1x1x10x24x128xf32> to vector<10x24x128xf32>
    %5 = vector.shape_cast %4 : vector<10x24x128xf32> to vector<240x128xf32>
    %6 = arith.truncf %5 : vector<240x128xf32> to vector<240x128xbf16>
    %c0_3 = arith.constant 0 : index
    %c0_4 = arith.constant 0 : index
    %c0_5 = arith.constant 0 : index
    %7 = vector.load %arg4[%c0_3, %c0_4, %c0_5] : memref<1x128x128xbf16, #tpu.memory_space<vmem>>, vector<1x128x128xbf16>
    %8 = vector.shape_cast %7 : vector<1x128x128xbf16> to vector<128x128xbf16>
    %cst = arith.constant dense<0.000000e+00> : vector<240x128xf32>
    %9 = tpu.matmul %6, %8, %cst {dimension_numbers = #tpu.dot_dimension_numbers<[1], [0], [0], [1], [0, 0, 1, 1], [], []>} : vector<240x128xbf16>, vector<128x128xbf16>, vector<240x128xf32> -> vector<240x128xf32>
    %c0_6 = arith.constant 0 : index
    %c0_7 = arith.constant 0 : index
    %c0_8 = arith.constant 0 : index
    %10 = vector.load %arg5[%c0_6, %c0_7, %c0_8] : memref<1x1x128xf32, #tpu.memory_space<vmem>>, vector<1x1x128xf32>
    %11 = vector.shape_cast %10 : vector<1x1x128xf32> to vector<1x128xf32>
    %12 = vector.broadcast %11 : vector<1x128xf32> to vector<240x128xf32>
    %13 = arith.addf %9, %12 : vector<240x128xf32>
    %cst_9 = arith.constant 0.000000e+00 : f32
    %14 = vector.broadcast %cst_9 : f32 to vector<240x128xf32>
    %15 = arith.maximumf %13, %14 : vector<240x128xf32>
    %16 = vector.shape_cast %15 : vector<240x128xf32> to vector<10x24x128xf32>
    %17 = tpu.iota {dimensions = array<i32: 0>} : vector<10x24x1xi32>
    %18 = vector.broadcast %1 : i32 to vector<10x24x1xi32>
    %19 = arith.addi %18, %17 : vector<10x24x1xi32>
    %20 = tpu.iota {dimensions = array<i32: 1>} : vector<10x24x1xi32>
    %c1_i32 = arith.constant 1 : i32
    %21 = vector.broadcast %c1_i32 : i32 to vector<10x24x1xi32>
    %22 = arith.cmpi sge, %19, %21 : vector<10x24x1xi32>
    %c16_i32 = arith.constant 16 : i32
    %23 = vector.broadcast %c16_i32 : i32 to vector<10x24x1xi32>
    %24 = arith.cmpi sle, %19, %23 : vector<10x24x1xi32>
    %25 = arith.andi %22, %24 : vector<10x24x1xi1>
    %c1_i32_10 = arith.constant 1 : i32
    %26 = vector.broadcast %c1_i32_10 : i32 to vector<10x24x1xi32>
    %27 = arith.cmpi sge, %20, %26 : vector<10x24x1xi32>
    %28 = arith.andi %25, %27 : vector<10x24x1xi1>
    %c16_i32_11 = arith.constant 16 : i32
    %29 = vector.broadcast %c16_i32_11 : i32 to vector<10x24x1xi32>
    %30 = arith.cmpi sle, %20, %29 : vector<10x24x1xi32>
    %31 = arith.andi %28, %30 : vector<10x24x1xi1>
    %cst_12 = arith.constant 0.000000e+00 : f32
    %32 = vector.shape_cast %31 : vector<10x24x1xi1> to vector<10x24x1xi1>
    %33 = vector.broadcast %32 : vector<10x24x1xi1> to vector<10x24x128xi1>
    %34 = vector.broadcast %cst_12 : f32 to vector<10x24x128xf32>
    %35 = arith.select %33, %16, %34 : vector<10x24x128xi1>, vector<10x24x128xf32>
    %36 = arith.truncf %35 : vector<10x24x128xf32> to vector<10x24x128xbf16>
    %cst_13 = arith.constant 0.000000e+00 : f32
    %37 = vector.broadcast %cst_13 : f32 to vector<128x128xf32>
    %38 = vector.extract_strided_slice %36 {offsets = [0, 0, 0], sizes = [8, 16, 128], strides = [1, 1, 1]} : vector<10x24x128xbf16> to vector<8x16x128xbf16>
    %39 = vector.shape_cast %38 : vector<8x16x128xbf16> to vector<128x128xbf16>
    %c0_14 = arith.constant 0 : index
    %c0_15 = arith.constant 0 : index
    %c0_16 = arith.constant 0 : index
    %c0_17 = arith.constant 0 : index
    %40 = vector.load %arg6[%c0_14, %c0_15, %c0_16, %c0_17] : memref<1x9x128x128xbf16, #tpu.memory_space<vmem>>, vector<1x1x128x128xbf16>
    %41 = vector.shape_cast %40 : vector<1x1x128x128xbf16> to vector<128x128xbf16>
    %cst_18 = arith.constant dense<0.000000e+00> : vector<128x128xf32>
    %42 = tpu.matmul %39, %41, %cst_18 {dimension_numbers = #tpu.dot_dimension_numbers<[1], [0], [0], [1], [0, 0, 1, 1], [], []>} : vector<128x128xbf16>, vector<128x128xbf16>, vector<128x128xf32> -> vector<128x128xf32>
    %43 = arith.addf %37, %42 : vector<128x128xf32>
    %44 = vector.extract_strided_slice %36 {offsets = [0, 1, 0], sizes = [8, 16, 128], strides = [1, 1, 1]} : vector<10x24x128xbf16> to vector<8x16x128xbf16>
    %45 = vector.shape_cast %44 : vector<8x16x128xbf16> to vector<128x128xbf16>
    %c0_19 = arith.constant 0 : index
    %c1 = arith.constant 1 : index
    %c0_20 = arith.constant 0 : index
    %c0_21 = arith.constant 0 : index
    %46 = vector.load %arg6[%c0_19, %c1, %c0_20, %c0_21] : memref<1x9x128x128xbf16, #tpu.memory_space<vmem>>, vector<1x1x128x128xbf16>
    %47 = vector.shape_cast %46 : vector<1x1x128x128xbf16> to vector<128x128xbf16>
    %cst_22 = arith.constant dense<0.000000e+00> : vector<128x128xf32>
    %48 = tpu.matmul %45, %47, %cst_22 {dimension_numbers = #tpu.dot_dimension_numbers<[1], [0], [0], [1], [0, 0, 1, 1], [], []>} : vector<128x128xbf16>, vector<128x128xbf16>, vector<128x128xf32> -> vector<128x128xf32>
    %49 = arith.addf %43, %48 : vector<128x128xf32>
    %50 = vector.extract_strided_slice %36 {offsets = [0, 2, 0], sizes = [8, 16, 128], strides = [1, 1, 1]} : vector<10x24x128xbf16> to vector<8x16x128xbf16>
    %51 = vector.shape_cast %50 : vector<8x16x128xbf16> to vector<128x128xbf16>
    %c0_23 = arith.constant 0 : index
    %c2 = arith.constant 2 : index
    %c0_24 = arith.constant 0 : index
    %c0_25 = arith.constant 0 : index
    %52 = vector.load %arg6[%c0_23, %c2, %c0_24, %c0_25] : memref<1x9x128x128xbf16, #tpu.memory_space<vmem>>, vector<1x1x128x128xbf16>
    %53 = vector.shape_cast %52 : vector<1x1x128x128xbf16> to vector<128x128xbf16>
    %cst_26 = arith.constant dense<0.000000e+00> : vector<128x128xf32>
    %54 = tpu.matmul %51, %53, %cst_26 {dimension_numbers = #tpu.dot_dimension_numbers<[1], [0], [0], [1], [0, 0, 1, 1], [], []>} : vector<128x128xbf16>, vector<128x128xbf16>, vector<128x128xf32> -> vector<128x128xf32>
    %55 = arith.addf %49, %54 : vector<128x128xf32>
    %56 = vector.extract_strided_slice %36 {offsets = [1, 0, 0], sizes = [8, 16, 128], strides = [1, 1, 1]} : vector<10x24x128xbf16> to vector<8x16x128xbf16>
    %57 = vector.shape_cast %56 : vector<8x16x128xbf16> to vector<128x128xbf16>
    %c0_27 = arith.constant 0 : index
    %c3 = arith.constant 3 : index
    %c0_28 = arith.constant 0 : index
    %c0_29 = arith.constant 0 : index
    %58 = vector.load %arg6[%c0_27, %c3, %c0_28, %c0_29] : memref<1x9x128x128xbf16, #tpu.memory_space<vmem>>, vector<1x1x128x128xbf16>
    %59 = vector.shape_cast %58 : vector<1x1x128x128xbf16> to vector<128x128xbf16>
    %cst_30 = arith.constant dense<0.000000e+00> : vector<128x128xf32>
    %60 = tpu.matmul %57, %59, %cst_30 {dimension_numbers = #tpu.dot_dimension_numbers<[1], [0], [0], [1], [0, 0, 1, 1], [], []>} : vector<128x128xbf16>, vector<128x128xbf16>, vector<128x128xf32> -> vector<128x128xf32>
    %61 = arith.addf %55, %60 : vector<128x128xf32>
    %62 = vector.extract_strided_slice %36 {offsets = [1, 1, 0], sizes = [8, 16, 128], strides = [1, 1, 1]} : vector<10x24x128xbf16> to vector<8x16x128xbf16>
    %63 = vector.shape_cast %62 : vector<8x16x128xbf16> to vector<128x128xbf16>
    %c0_31 = arith.constant 0 : index
    %c4 = arith.constant 4 : index
    %c0_32 = arith.constant 0 : index
    %c0_33 = arith.constant 0 : index
    %64 = vector.load %arg6[%c0_31, %c4, %c0_32, %c0_33] : memref<1x9x128x128xbf16, #tpu.memory_space<vmem>>, vector<1x1x128x128xbf16>
    %65 = vector.shape_cast %64 : vector<1x1x128x128xbf16> to vector<128x128xbf16>
    %cst_34 = arith.constant dense<0.000000e+00> : vector<128x128xf32>
    %66 = tpu.matmul %63, %65, %cst_34 {dimension_numbers = #tpu.dot_dimension_numbers<[1], [0], [0], [1], [0, 0, 1, 1], [], []>} : vector<128x128xbf16>, vector<128x128xbf16>, vector<128x128xf32> -> vector<128x128xf32>
    %67 = arith.addf %61, %66 : vector<128x128xf32>
    %68 = vector.extract_strided_slice %36 {offsets = [1, 2, 0], sizes = [8, 16, 128], strides = [1, 1, 1]} : vector<10x24x128xbf16> to vector<8x16x128xbf16>
    %69 = vector.shape_cast %68 : vector<8x16x128xbf16> to vector<128x128xbf16>
    %c0_35 = arith.constant 0 : index
    %c5 = arith.constant 5 : index
    %c0_36 = arith.constant 0 : index
    %c0_37 = arith.constant 0 : index
    %70 = vector.load %arg6[%c0_35, %c5, %c0_36, %c0_37] : memref<1x9x128x128xbf16, #tpu.memory_space<vmem>>, vector<1x1x128x128xbf16>
    %71 = vector.shape_cast %70 : vector<1x1x128x128xbf16> to vector<128x128xbf16>
    %cst_38 = arith.constant dense<0.000000e+00> : vector<128x128xf32>
    %72 = tpu.matmul %69, %71, %cst_38 {dimension_numbers = #tpu.dot_dimension_numbers<[1], [0], [0], [1], [0, 0, 1, 1], [], []>} : vector<128x128xbf16>, vector<128x128xbf16>, vector<128x128xf32> -> vector<128x128xf32>
    %73 = arith.addf %67, %72 : vector<128x128xf32>
    %74 = vector.extract_strided_slice %36 {offsets = [2, 0, 0], sizes = [8, 16, 128], strides = [1, 1, 1]} : vector<10x24x128xbf16> to vector<8x16x128xbf16>
    %75 = vector.shape_cast %74 : vector<8x16x128xbf16> to vector<128x128xbf16>
    %c0_39 = arith.constant 0 : index
    %c6 = arith.constant 6 : index
    %c0_40 = arith.constant 0 : index
    %c0_41 = arith.constant 0 : index
    %76 = vector.load %arg6[%c0_39, %c6, %c0_40, %c0_41] : memref<1x9x128x128xbf16, #tpu.memory_space<vmem>>, vector<1x1x128x128xbf16>
    %77 = vector.shape_cast %76 : vector<1x1x128x128xbf16> to vector<128x128xbf16>
    %cst_42 = arith.constant dense<0.000000e+00> : vector<128x128xf32>
    %78 = tpu.matmul %75, %77, %cst_42 {dimension_numbers = #tpu.dot_dimension_numbers<[1], [0], [0], [1], [0, 0, 1, 1], [], []>} : vector<128x128xbf16>, vector<128x128xbf16>, vector<128x128xf32> -> vector<128x128xf32>
    %79 = arith.addf %73, %78 : vector<128x128xf32>
    %80 = vector.extract_strided_slice %36 {offsets = [2, 1, 0], sizes = [8, 16, 128], strides = [1, 1, 1]} : vector<10x24x128xbf16> to vector<8x16x128xbf16>
    %81 = vector.shape_cast %80 : vector<8x16x128xbf16> to vector<128x128xbf16>
    %c0_43 = arith.constant 0 : index
    %c7 = arith.constant 7 : index
    %c0_44 = arith.constant 0 : index
    %c0_45 = arith.constant 0 : index
    %82 = vector.load %arg6[%c0_43, %c7, %c0_44, %c0_45] : memref<1x9x128x128xbf16, #tpu.memory_space<vmem>>, vector<1x1x128x128xbf16>
    %83 = vector.shape_cast %82 : vector<1x1x128x128xbf16> to vector<128x128xbf16>
    %cst_46 = arith.constant dense<0.000000e+00> : vector<128x128xf32>
    %84 = tpu.matmul %81, %83, %cst_46 {dimension_numbers = #tpu.dot_dimension_numbers<[1], [0], [0], [1], [0, 0, 1, 1], [], []>} : vector<128x128xbf16>, vector<128x128xbf16>, vector<128x128xf32> -> vector<128x128xf32>
    %85 = arith.addf %79, %84 : vector<128x128xf32>
    %86 = vector.extract_strided_slice %36 {offsets = [2, 2, 0], sizes = [8, 16, 128], strides = [1, 1, 1]} : vector<10x24x128xbf16> to vector<8x16x128xbf16>
    %87 = vector.shape_cast %86 : vector<8x16x128xbf16> to vector<128x128xbf16>
    %c0_47 = arith.constant 0 : index
    %c8 = arith.constant 8 : index
    %c0_48 = arith.constant 0 : index
    %c0_49 = arith.constant 0 : index
    %88 = vector.load %arg6[%c0_47, %c8, %c0_48, %c0_49] : memref<1x9x128x128xbf16, #tpu.memory_space<vmem>>, vector<1x1x128x128xbf16>
    %89 = vector.shape_cast %88 : vector<1x1x128x128xbf16> to vector<128x128xbf16>
    %cst_50 = arith.constant dense<0.000000e+00> : vector<128x128xf32>
    %90 = tpu.matmul %87, %89, %cst_50 {dimension_numbers = #tpu.dot_dimension_numbers<[1], [0], [0], [1], [0, 0, 1, 1], [], []>} : vector<128x128xbf16>, vector<128x128xbf16>, vector<128x128xf32> -> vector<128x128xf32>
    %91 = arith.addf %85, %90 : vector<128x128xf32>
    %c0_51 = arith.constant 0 : index
    %c0_52 = arith.constant 0 : index
    %c0_53 = arith.constant 0 : index
    %92 = vector.load %arg7[%c0_51, %c0_52, %c0_53] : memref<1x1x128xf32, #tpu.memory_space<vmem>>, vector<1x1x128xf32>
    %93 = vector.shape_cast %92 : vector<1x1x128xf32> to vector<1x128xf32>
    %94 = vector.broadcast %93 : vector<1x128xf32> to vector<128x128xf32>
    %95 = arith.addf %91, %94 : vector<128x128xf32>
    %cst_54 = arith.constant 0.000000e+00 : f32
    %96 = vector.broadcast %cst_54 : f32 to vector<128x128xf32>
    %97 = arith.maximumf %95, %96 : vector<128x128xf32>
    %98 = arith.truncf %97 : vector<128x128xf32> to vector<128x128xbf16>
    %c0_55 = arith.constant 0 : index
    %c0_56 = arith.constant 0 : index
    %c0_57 = arith.constant 0 : index
    %99 = vector.load %arg8[%c0_55, %c0_56, %c0_57] : memref<1x128x128xbf16, #tpu.memory_space<vmem>>, vector<1x128x128xbf16>
    %100 = vector.shape_cast %99 : vector<1x128x128xbf16> to vector<128x128xbf16>
    %cst_58 = arith.constant dense<0.000000e+00> : vector<128x128xf32>
    %101 = tpu.matmul %98, %100, %cst_58 {dimension_numbers = #tpu.dot_dimension_numbers<[1], [0], [0], [1], [0, 0, 1, 1], [], []>} : vector<128x128xbf16>, vector<128x128xbf16>, vector<128x128xf32> -> vector<128x128xf32>
    %c0_59 = arith.constant 0 : index
    %c0_60 = arith.constant 0 : index
    %c0_61 = arith.constant 0 : index
    %102 = vector.load %arg9[%c0_59, %c0_60, %c0_61] : memref<1x1x128xf32, #tpu.memory_space<vmem>>, vector<1x1x128xf32>
    %103 = vector.shape_cast %102 : vector<1x1x128xf32> to vector<1x128xf32>
    %104 = vector.broadcast %103 : vector<1x128xf32> to vector<128x128xf32>
    %105 = arith.addf %101, %104 : vector<128x128xf32>
    %106 = vector.extract_strided_slice %4 {offsets = [1, 1, 0], sizes = [8, 16, 128], strides = [1, 1, 1]} : vector<10x24x128xf32> to vector<8x16x128xf32>
    %107 = vector.shape_cast %106 : vector<8x16x128xf32> to vector<128x128xf32>
    %108 = arith.addf %105, %107 : vector<128x128xf32>
    %cst_62 = arith.constant 0.000000e+00 : f32
    %109 = vector.broadcast %cst_62 : f32 to vector<128x128xf32>
    %110 = arith.maximumf %108, %109 : vector<128x128xf32>
    %111 = vector.shape_cast %110 : vector<128x128xf32> to vector<8x16x128xf32>
    %c0_63 = arith.constant 0 : index
    %c0_64 = arith.constant 0 : index
    %c0_65 = arith.constant 0 : index
    %c0_66 = arith.constant 0 : index
    %c0_67 = arith.constant 0 : index
    %112 = vector.load %arg10[%c0_63, %c0_64, %c0_65, %c0_66, %c0_67] : memref<1x1x8x16x128xf32, #tpu.memory_space<vmem>>, vector<1x1x8x16x128xf32>
    %113 = vector.shape_cast %112 : vector<1x1x8x16x128xf32> to vector<8x16x128xf32>
    %114 = vector.shape_cast %111 : vector<8x16x128xf32> to vector<1x1x8x16x128xf32>
    tpu.vector_store %arg10[%c0_63, %c0_64, %c0_65, %c0_66, %c0_67], %114 {strides = array<i32>} : memref<1x1x8x16x128xf32, #tpu.memory_space<vmem>>, vector<1x1x8x16x128xf32>,
    return
  }
  func.func @transform_0(%arg0: i32, %arg1: i32, %arg2: i32) -> (i32, i32, i32, i32, i32) {
    %c0_i32 = arith.constant 0 : i32
    %c0_i32_0 = arith.constant 0 : i32
    %c0_i32_1 = arith.constant 0 : i32
    %c0_i32_2 = arith.constant 0 : i32
    return %arg0, %arg1, %c0_i32, %c0_i32_0, %c0_i32_1 : i32, i32, i32, i32, i32
  }
  func.func @transform_1(%arg0: i32, %arg1: i32, %arg2: i32) -> (i32, i32, i32) {
    %c0_i32 = arith.constant 0 : i32
    %c0_i32_0 = arith.constant 0 : i32
    %c0_i32_1 = arith.constant 0 : i32
    return %arg0, %c0_i32, %c0_i32_0 : i32, i32, i32
  }
  func.func @transform_2(%arg0: i32, %arg1: i32, %arg2: i32) -> (i32, i32, i32) {
    %c0_i32 = arith.constant 0 : i32
    %c0_i32_0 = arith.constant 0 : i32
    %c0_i32_1 = arith.constant 0 : i32
    return %arg0, %c0_i32, %c0_i32_0 : i32, i32, i32
  }
  func.func @transform_3(%arg0: i32, %arg1: i32, %arg2: i32) -> (i32, i32, i32, i32) {
    %c0_i32 = arith.constant 0 : i32
    %c0_i32_0 = arith.constant 0 : i32
    %c0_i32_1 = arith.constant 0 : i32
    %c0_i32_2 = arith.constant 0 : i32
    return %arg0, %c0_i32, %c0_i32_0, %c0_i32_1 : i32, i32, i32, i32
  }
  func.func @transform_4(%arg0: i32, %arg1: i32, %arg2: i32) -> (i32, i32, i32) {
    %c0_i32 = arith.constant 0 : i32
    %c0_i32_0 = arith.constant 0 : i32
    %c0_i32_1 = arith.constant 0 : i32
    return %arg0, %c0_i32, %c0_i32_0 : i32, i32, i32
  }
  func.func @transform_5(%arg0: i32, %arg1: i32, %arg2: i32) -> (i32, i32, i32) {
    %c0_i32 = arith.constant 0 : i32
    %c0_i32_0 = arith.constant 0 : i32
    %c0_i32_1 = arith.constant 0 : i32
    return %arg0, %c0_i32, %c0_i32_0 : i32, i32, i32
  }
  func.func @transform_6(%arg0: i32, %arg1: i32, %arg2: i32) -> (i32, i32, i32) {
    %c0_i32 = arith.constant 0 : i32
    %c0_i32_0 = arith.constant 0 : i32
    %c0_i32_1 = arith.constant 0 : i32
    return %arg0, %c0_i32, %c0_i32_0 : i32, i32, i32
  }
  func.func @transform_7(%arg0: i32, %arg1: i32, %arg2: i32) -> (i32, i32, i32, i32, i32) {
    %c0_i32 = arith.constant 0 : i32
    %c0_i32_0 = arith.constant 0 : i32
    %c0_i32_1 = arith.constant 0 : i32
    return %arg0, %arg1, %arg2, %c0_i32, %c0_i32_0 : i32, i32, i32, i32, i32
  }
}

</mosaic_0001>

<bundles_post_ra>
// kernel: tpu_custom_call.1
= control target key start
LH: loop header
LB: loop body
LE: loop exit
PB: predicated region body
PF: predicated region fallthrough
CT: control target
= control target key end

     0   :  { %s6368_s0 = inlined_call_operand.hbm [shape: f32[2,2,18,24,128], index: 0, kind: input, shape index: {}]   ;;  %s6369_s1 = inlined_call_operand.hbm [shape: bf16[2,128,128], index: 1, kind: input, shape index: {}]   ;;  %s6370_s2 = inlined_call_operand.vmem [shape: f32[2,1,128], index: 2, kind: input, shape index: {}]   ;;  %s6371_s3 = inlined_call_operand.hbm [shape: bf16[2,9,128,128], index: 3, kind: input, shape index: {}]   ;;  %s6372_s4 = inlined_call_operand.vmem [shape: f32[2,1,128], index: 4, kind: input, shape index: {}]   ;;  %s6373_s5 = inlined_call_operand.hbm [shape: bf16[2,128,128], index: 5, kind: input, shape index: {}]   ;;  %s6374_s6 = inlined_call_operand.vmem [shape: f32[2,1,128], index: 6, kind: input, shape index: {}]   ;;  %s6375_s7 = inlined_call_operand.hbm [shape: f32[2,2,16,16,128], index: 7, kind: output, shape index: {}]  }
   0x1   :  { %6423 = sst [smem:[#allocation57_spill]] %s6368_s0 }
   0x2   :  { %6424 = sst [smem:[#allocation58_spill]] %s6369_s1 }
   0x3   :  { %6425 = sst [smem:[#allocation59_spill]] %s6370_s2 }
   0x4   :  { %6426 = sst [smem:[#allocation60_spill]] %s6372_s4 }
   0x5   :  { %6427 = sst [smem:[#allocation61_spill]] %s6374_s6 }
   0x6   :  { %6428 = sst [smem:[#allocation62_spill]] %s6375_s7 }
   0x7   :  { %12 = vsyncpa [#allocation3], 0 }
   0x8   :  { %14 = vsyncpa [#allocation3 + $0x1], 0 }
   0x9   :  { %15 = vsyncpa [#allocation6], 0 }
   0xa   :  { %17 = vsyncpa [#allocation6 + $0x1], 0 }
   0xb   :  { %18 = vsyncpa [#allocation9], 0 }
   0xc   :  { %20 = vsyncpa [#allocation9 + $0x1], 0 }
   0xd   :  { %21 = vsyncpa [#allocation4], 0 }
   0xe   :  { %23 = vsyncpa [#allocation4 + $0x1], 0  ;;  %s4842_s24 = smov 0   ;;  %s4844_s25 = smov 0  }
   0xf   :  { %s4846_s26 = smov 0   ;;  %s4848_s27 = smov 0  }
  0x10   :  { %s4850_s28 = smov 0   ;;  %s4852_s29 = smov 0  }
  0x11   :  { %s4854_s30 = smov 0   ;;  %s4856_s8 = smov 0  }
  0x12   :  { %s4858_s9 = smov 0   ;;  %s4860_s10 = smov 0  }
  0x13   :  { %s4862_s11 = smov 0   ;;  %s4864_s12 = smov 0  }
  0x14   :  { %s4866_s13 = smov 0   ;;  %s4868_s14 = smov 0  }
  0x15   :  { %s4870_s15 = smov 0   ;;  %s4872_s16 = smov 0  }
  0x16 LB: > { %6429 = sst [smem:[#allocation15_spill]] %s4727_s24  ;;  %p65_p0 = scmp.eq.s32.totalorder %s4787_s16, 0  ;;  %s4787_s16 = sphi %s4872_s16, %s29_s16   ;;  %s4783_s15 = sphi %s4870_s15, %s6647_s15   ;;  %s4779_s14 = sphi %s4868_s14, %s6640_s14   ;;  %s4775_s13 = sphi %s4866_s13, %s6639_s13   ;;  %s4771_s12 = sphi %s4864_s12, %s6646_s12   ;;  %s4767_s11 = sphi %s4862_s11, %s6638_s11   ;;  %s4763_s10 = sphi %s4860_s10, %s6637_s10   ;;  %s4759_s9 = sphi %s4858_s9, %s6636_s9   ;;  %s4755_s8 = sphi %s4856_s8, %s6645_s8   ;;  %s4751_s30 = sphi %s4854_s30, %s6644_s30   ;;  %s4747_s29 = sphi %s4852_s29, %s6634_s29   ;;  %s4743_s28 = sphi %s4850_s28, %s6633_s28   ;;  %s4739_s27 = sphi %s4848_s27, %s6632_s27   ;;  %s4735_s26 = sphi %s4846_s26, %s6631_s26   ;;  %s4731_s25 = sphi %s4844_s25, %s6643_s25   ;;  %s4727_s24 = sphi %s4842_s24, %s6642_s24  }
  0x17   : > { %6430 = sst [smem:[#allocation16_spill]] %s4735_s26  ;;  %p90_p1 = scmp.ne.s32.totalorder %s4747_s29, %s4743_s28 }
  0x18   : > { %6431 = sst [smem:[#allocation17_spill]] %s4743_s28  ;;  %p96_p2 = scmp.ne.s32.totalorder %s4743_s28, %s4739_s27 }
  0x19   : > { %6432 = sst [smem:[#allocation18_spill]] %s4747_s29  ;;  %p6393_p3 = scmp.lt.s32.totalorder %s4787_s16, 8 }
  0x1a   : > { %6433 = sst [smem:[#allocation19_spill]] %s4759_s9  ;;  %p92_p4 = por %p90_p1, %p65_p0 }
  0x1b   : > { %6434 = sst [smem:[#allocation20_spill]] %s4763_s10  ;;  %s303_s18 = sand.u32 1, %s4787_s16  }
  0x1c   : > { %6435 = sst [smem:[#allocation21_spill]] %s4767_s11  ;;  %s4933_s19 = sand.u32 1, %s4747_s29  }
  0x1d   : > { %6436 = sst [smem:[#allocation22_spill]] %s4771_s12  ;;  %s6377_s20 = sshll.u32 %s4933_s19, 6 }
  0x1e   : > { %6437 = sst [smem:[#allocation23_spill]] %s4775_s13  ;;  %s6378_s21 = sshll.u32 %s4783_s15, 10 }
  0x1f   : > { %6438 = sst [smem:[#allocation24_spill]] %s4779_s14  ;;  %s307_s11 = scalar_lea.vmem [#allocation5], %s6377_s20 }
  0x20   : > { %6439 = sst [smem:[#allocation25_spill]] %s4787_s16  ;;  %s314_s17 = sshll.u32 %s307_s11, 4  ;;  %s315_s17 = int_to_ptr.vmem [resolvable:$true] %s314_s17 }
  0x21   : > { %s6440_s1 = sld [smem:[#allocation58_spill]]  ;;  %p4946_p5 = pnand %p6393_p3, %p92_p4 }
  0x22   : > { %s4950_s4 = scalar_lea.sflag [#allocation6], %s303_s18  ;;  %s4520_s2 = scalar_lea.vmem %s315_s17, 1024 }
  0x23   : > { %p6391_p6 = pneg %p4946_p5  ;;  %p4521_p7 = scmp.ne.s32.totalorder %s315_s17, %s4520_s2 }
  0x24   : > { %s4789_s22 = smov [#allocation5]  }
  0x25   : > { %p4523_p8 = pnand %p4521_p7, %p6391_p6  ;;  %s4525_s11 = sshll.u32 %s4789_s22, 4  ;;  %s4526_s11 = int_to_ptr.vmem [resolvable:$false] %s4525_s11 }
  0x26   : > { %s4527_s23 = scalar_lea.vmem %s4526_s11, 2048  ;;  %p4528_p10 = scmp.lt.s32.totalorder %s315_s17, %s4526_s11 }
  0x27   : > { %s313_s7 = scalar_lea.hbm %s6440_s1, %s6378_s21  ;;  %p4524_p9 = pneg %p4523_p8 }
  0x28   : > { %p4529_p11 = scmp.lt.s32.totalorder %s4527_s23, %s4520_s2 }
  0x2a   : > { %p4530_p12 = por %p4529_p11, %p4528_p10 }
  0x2c   : > { %p4531_p13 = pnand %p4530_p12, %p4524_p9 }
  0x2e   : > { %4534 = shalt.err (!%p4531_p13)
}
  0x2f   : > { %s6379_s20 = smov 64   ;;  %s6381_s2 = smov 4  }
  0x30   : > { %4246 = dma.hbm_to_vmem [thread:$0]  (!%p4946_p5), %s313_s7, 1024, %s315_s17, %s4950_s4, %s6379_s20, %s6379_s20, %s6381_s2  }
  0x31   : > { %p3336_p1 = scmp.ge.s32.totalorder %s4787_s16, 1  ;;  %p382_p4 = scmp.lt.s32.totalorder %s4787_s16, 9 }
  0x32   : > { %s4970_s22 = sadd.s32 4294967295, %s4787_s16   ;;  %s3325_s11 = sadd.s32 4294967294, %s4787_s16  }
  0x33   : > { %p4965_p7 = pnand %p3336_p1, %p382_p4  ;;  %6443 = sst [smem:[#allocation26_spill]] %s4970_s22 }
  0x34   : > { %s41_s23 = sadd.s32 1, %s4775_s13  ;;  %s44_s21 = sadd.s32 1, %s4779_s14 }
  0x35   : > { %p42_p8 = scmp.ge.s32.totalorder %s41_s23, 2  ;;  %s48_s7 = sadd.s32 1, %s4783_s15 }
  0x36   : > { %s57_s17 = sadd.s32 1, %s4759_s9  ;;  %p64_p9 = scmp.ne.s32.totalorder %s4759_s9, %s4755_s8 }
  0x37   : > { %s6649_s23 = smov (%p42_p8, %s41_s23), 0  ;;  %s6651_s21 = smov (!%p42_p8, %s44_s21), %s4779_s14 }
  0x38   : > { %6444 = sst [smem:[#allocation27_spill]] %s6649_s23  ;;  %p70_p10 = scmp.ne.s32.totalorder %s4755_s8, %s4751_s30 }
  0x39   : > { %p46_p11 = scmp.ge.s32.totalorder %s6651_s21, 2  ;;  %p71_p12 = scmp.eq.s32.totalorder %s4970_s22, 0 }
  0x3a   : > { %p4987_p13 = por %p65_p0, %p64_p9  ;;  %s239_s2 = ssub.s32 %s4775_s13, %s6649_s23 }
  0x3b   : > { %s6653_s21 = smov (%p46_p11, %s6651_s21), 0  ;;  %s6655_s7 = smov (!%p46_p11, %s48_s7), %s4783_s15 }
  0x3c   : > { %6446 = sst [smem:[#allocation28_spill]] %s6653_s21  ;;  %s53_s1 = ssub.s32 %s4779_s14, %s6653_s21 }
  0x3d   : > { %p4998_p1 = por %p71_p12, %p70_p10  ;;  %p50_p4 = scmp.ge.s32.totalorder %s6655_s7, 2 }
  0x3e   : > { %p5005_p0 = por %p96_p2, %p71_p12  ;;  %s243_s23 = sadd.s32 1, %s4735_s26 }
  0x3f   : > { %p253_p8 = scmp.ne.s32.totalorder %s4735_s26, %s4731_s25  ;;  %s6657_s7 = smov (%p50_p4, %s6655_s7), 0 }
  0x40   : > { %s6448_s30 = scalar_select %p5005_p0, 1, 0 }
  0x41   : > { %6450 = sst [smem:[#allocation30_spill]] %s6657_s7  ;;  %p254_p9 = scmp.eq.s32.totalorder %s4970_s22, 7 }
  0x42   : > { %6449 = sst [smem:[#allocation29_spill]] %s6448_s30  ;;  %p259_p10 = scmp.ne.s32.totalorder %s4731_s25, %s4727_s24 }
  0x43   : > { %s52_s21 = ssub.s32 %s4783_s15, %s6657_s7  ;;  %p260_p11 = scmp.eq.s32.totalorder %s3325_s11, 7 }
  0x44   : > { %s54_s27 = sor.u32 %s53_s1, %s52_s21  ;;  %p81_p2 = scmp.eq.s32.totalorder %s52_s21, 0 }
  0x45   : > { %p55_p12 = scmp.eq.s32.totalorder %s54_s27, 0  ;;  %s240_s13 = sor.u32 %s239_s2, %s54_s27 }
  0x46   : > { %s6451_s10 = sadd.s32 1, %s4747_s29  ;;  %p241_p4 = scmp.eq.s32.totalorder %s240_s13, 0 }
  0x47   : > { %s5022_s30 = scalar_select %p81_p2, %s4747_s29, %s6451_s10  }
  0x48   : > { %s5025_s28 = scalar_select %p55_p12, %s4759_s9, %s57_s17  }
  0x49   : > { %6452 = sst [smem:[#allocation31_spill]] %s5022_s30  ;;  %p5030_p6 = por %p254_p9, %p253_p8 }
  0x4a   : > { %6453 = sst [smem:[#allocation32_spill]] %s5025_s28  ;;  %p5034_p3 = por %p260_p11, %p259_p10 }
  0x4b   : > { %s280_s11 = sand.u32 1, %s4759_s9   ;;  %s4224_s2 = smul.u32 54, %s4779_s14 }
  0x4c   : > { %s6455_s24 = scalar_select %p5034_p3, 1, 0 }
  0x4d   : > { %s5040_s1 = scalar_select %p241_p4, %s4735_s26, %s243_s23  }
  0x4e   : > { %6456 = sst [smem:[#allocation33_spill]] %s6455_s24  ;;  %s4223_s21 = smul.u32 432, %s280_s11 }
  0x4f   : > { %6457 = sst [smem:[#allocation34_spill]] %s5040_s1  ;;  %p6458_p2 = scmp.lt.s32.totalorder %s4787_s16, 8 }
  0x50   : > { %s4225_s13 = smul.u32 108, %s4783_s15  ;;  %s284_s17 = scalar_lea.vmem [#allocation2], %s4223_s21 }
  0x51   : > { %p5047_p0 = pnand %p6458_p2, %p4987_p13  ;;  %s293_s27 = sshll.u32 %s284_s17, 4  ;;  %s294_s27 = int_to_ptr.vmem [resolvable:$true] %s293_s27 }
  0x52   : > { %s290_s7 = sadd.s32 %s4225_s13, %s4224_s2  ;;  %s6460_s0 = sld [smem:[#allocation57_spill]] }
  0x53   : > { %s3328_s28 = sshll.u32 %s290_s7, 7  ;;  %s281_s9 = scalar_lea.sflag [#allocation3], %s280_s11 }
  0x54   : > { %p4537_p8 = pneg %p5047_p0  ;;  %s4548_s20 = scalar_lea.vmem %s294_s27, 6912 }
  0x55   : > { %p4549_p9 = scmp.ne.s32.totalorder %s294_s27, %s4548_s20  ;;  %s4792_s14 = smov [#allocation2]  }
  0x56   : > { %s4553_s1 = sshll.u32 %s4792_s14, 4  ;;  %s4554_s1 = int_to_ptr.vmem [resolvable:$false] %s4553_s1 }
  0x57   : > { %p4551_p13 = pnand %p4549_p9, %p4537_p8  ;;  %s4555_s26 = scalar_lea.vmem %s4554_s1, 13824 }
  0x58   : > { %s292_s23 = scalar_lea.hbm %s6460_s0, %s3328_s28  ;;  %p4556_p11 = scmp.lt.s32.totalorder %s294_s27, %s4554_s1 }
  0x59   : > { %p4552_p10 = pneg %p4551_p13  ;;  %p4557_p12 = scmp.lt.s32.totalorder %s4555_s26, %s4548_s20 }
  0x5b   : > { %p4558_p4 = por %p4557_p12, %p4556_p11 }
  0x5d   : > { %p4559_p2 = pnand %p4558_p4, %p4552_p10 }
  0x5f   : > { %4562 = shalt.err (!%p4559_p2)
}
  0x60   : > { %s4793_s7 = smov 128   ;;  %s4794_s28 = smov 8  }
  0x61   : > { %4243 = dma.hbm_to_vmem [thread:$0]  (!%p5047_p0), %s292_s23, 6912, %s294_s27, %s281_s9, %s4793_s7, %s4793_s7, %s4794_s28  }
  0x62   : > { %s4226_s29 = smul.u32 576, %s4933_s19  ;;  %s6461_s14 = sshll.u32 %s4783_s15, 10 }
  0x63   : > { %s4227_s30 = smul.u32 9216, %s4783_s15  ;;  %s5066_s26 = scalar_lea.hbm %s6373_s5, %s6461_s14 }
  0x64   : > { %s334_s17 = scalar_lea.vmem [#allocation7], %s4226_s29  ;;  %s6462_s0 = sshll.u32 %s4933_s19, 6 }
  0x65   : > { %s340_s13 = scalar_lea.hbm %s6371_s3, %s4227_s30  ;;  %s341_s20 = sshll.u32 %s334_s17, 4  ;;  %s342_s20 = int_to_ptr.vmem [resolvable:$true] %s341_s20 }
  0x66   : > { %s361_s24 = scalar_lea.vmem [#allocation8], %s6462_s0  ;;  %s4576_s10 = scalar_lea.vmem %s342_s20, 9216 }
  0x67   : > { %s368_s16 = sshll.u32 %s361_s24, 4  ;;  %p4577_p0 = scmp.ne.s32.totalorder %s342_s20, %s4576_s10  ;;  %s369_s16 = int_to_ptr.vmem [resolvable:$true] %s368_s16 }
  0x68   : > { %p6463_p8 = pneg %p4946_p5  ;;  %s4795_s9 = smov [#allocation7]  }
  0x69   : > { %s4581_s27 = sshll.u32 %s4795_s9, 4  ;;  %s4582_s27 = int_to_ptr.vmem [resolvable:$false] %s4581_s27 }
  0x6a   : > { %p4579_p9 = pnand %p4577_p0, %p6463_p8  ;;  %s4583_s23 = scalar_lea.vmem %s4582_s27, 18432 }
  0x6b   : > { %p4584_p10 = scmp.lt.s32.totalorder %s342_s20, %s4582_s27  ;;  %p4585_p11 = scmp.lt.s32.totalorder %s4583_s23, %s4576_s10 }
  0x6c   : > { %p4580_p13 = pneg %p4579_p9 }
  0x6d   : > { %p4586_p12 = por %p4585_p11, %p4584_p10 }
  0x6f   : > { %p4587_p4 = pnand %p4586_p12, %p4580_p13 }
  0x71   : > { %4590 = shalt.err (!%p4587_p4)
}
  0x72   : > { %s6464_s7 = smov 4   ;;  %s6465_s0 = smov 64  }
  0x73   : > { %4249 = dma.hbm_to_vmem [thread:$0]  (!%p4946_p5), %s340_s13, 9216, %s342_s20, %s4950_s4, %s6465_s0, %s6465_s0, %s6464_s7  }
  0x74   : > { %s358_s24 = scalar_lea.sflag [#allocation9], %s4933_s19  ;;  %s4604_s28 = scalar_lea.vmem %s369_s16, 1024 }
  0x75   : > { %p4605_p2 = scmp.ne.s32.totalorder %s369_s16, %s4604_s28  ;;  %p6466_p0 = pmov %p6463_p8 }
  0x76   : > { %s4796_s29 = smov [#allocation8]  }
  0x77   : > { %p4607_p8 = pnand %p4605_p2, %p6466_p0  ;;  %s4609_s30 = sshll.u32 %s4796_s29, 4  ;;  %s4610_s30 = int_to_ptr.vmem [resolvable:$false] %s4609_s30 }
  0x78   : > { %s4611_s14 = scalar_lea.vmem %s4610_s30, 2048  ;;  %p4612_p13 = scmp.lt.s32.totalorder %s369_s16, %s4610_s30 }
  0x79   : > { %p4608_p9 = pneg %p4607_p8  ;;  %p4613_p10 = scmp.lt.s32.totalorder %s4611_s14, %s4604_s28 }
  0x7b   : > { %p4614_p11 = por %p4613_p10, %p4612_p13 }
  0x7d   : > { %p4615_p12 = pnand %p4614_p11, %p4608_p9 }
  0x7f   : > { %4618 = shalt.err (!%p4615_p12)
}
  0x80   : > { %4252 = dma.hbm_to_vmem [thread:$0]  (!%p4946_p5), %s5066_s26, 1024, %s369_s16, %s358_s24, %s6465_s0, %s6465_s0, %s6464_s7  }
  0x81   : > { %386 = sbr.rel (%p4965_p7) target bundleno = 1073 (0x431), region = 48 }
  0x86   : > { %s388_s4 = sand.u32 1, %s4755_s8  }
  0x87   : > { %s5095_s19 = smul.u32 432, %s388_s4  ;;  %s389_s11 = scalar_lea.sflag [#allocation3], %s388_s4 }
  0x89   : > { %s392_s21 = scalar_lea.vmem [#allocation2], %s5095_s19 }
  0x8a   : > { %4710 = dma.done.wait (%p4998_p1), %s389_s11, 6912  }
  0x8b   : > { %4712 = vsyncadd (%p4998_p1), %s389_s11, 4294960384  ;;  %s6467_s6 = sld [smem:[#allocation26_spill]] }
  0x8c   : > { %s6468_s1 = sld [smem:[#allocation17_spill]] }
  0x8d   : > { %s6469_s2 = sld [smem:[#allocation29_spill]] }
  0x91   : > { %s397_s16 = sand.u32 1, %s6467_s6  }
  0x92   : > { %s399_s26 = sand.u32 1, %s6468_s1   ;;  %s398_s13 = scalar_lea.sflag [#allocation6], %s397_s16 }
  0x93   : > { %s3337_s18 = sshll.u32 %s399_s26, 6  ;;  %p6470_p5 = scmp.ne.s32.totalorder %s6469_s2, 0 }
  0x94   : > { %s5104_s17 = scalar_lea.vmem [#allocation5], %s3337_s18 }
  0x95   : > { %4714 = dma.done.wait (%p6470_p5), %s398_s13, 10240  }
  0x96   : > { %4716 = vsyncadd (%p6470_p5), %s398_s13, 4294957056  ;;  %s4229_s20 = smul.u32 576, %s399_s26  ;;  %s416_s12 = scalar_lea.sflag [#allocation9], %s399_s26 }
  0x97   : > { %s5112_s9 = scalar_lea.vmem [#allocation8], %s3337_s18 }
  0x98   : > { %s5110_s10 = scalar_lea.vmem [#allocation7], %s4229_s20 }
  0x99   : > { %4718 = dma.done.wait (%p6470_p5), %s416_s12, 1024  }
  0x9a   : > { %4720 = vsyncadd (%p6470_p5), %s416_s12, 4294966272  ;;  %v4797_v0 = vmov 0.0   ;;  %s6471_s27 = sld [smem:[#allocation20_spill]]  ;;  %vm4798_vm0 = vmmov 0   ;;  %v4395_v1 = vld [vmem:[%s5104_s17 + $0x38] sm:$0xff]   ;;  %v4396_v2 = vld [vmem:[%s5104_s17 + $0x30] sm:$0xff]  }
  0x9b   : > { %3827 = vmatprep.subr.bf16.mxu0 %v4797_v0  ;;  %3843 = vmatprep.mubr.msk.bf16.mxu0 %vm4798_vm0, %v4797_v0  ;;  %v4397_v3 = vld [vmem:[%s5104_s17 + $0x28] sm:$0xff]   ;;  %v4398_v4 = vld [vmem:[%s5104_s17 + $0x20] sm:$0xff]   ;;  %v4399_v5 = vld [vmem:[%s5104_s17 + $0x18] sm:$0xff]   ;;  %s6472_s0 = sld [smem:[#allocation22_spill]]  ;;  %vm6406_vm11 = vcmask 1046528   ;;  %s471_s18 = sand.u32 1, %s4731_s25  }
  0x9c   : > { %3828 = vmatpush3.bf16.msra.mxu0 %v4395_v1  ;;  %v4400_v6 = vld [vmem:[%s5104_s17 + $0x10] sm:$0xff]   ;;  %v4401_v7 = vld [vmem:[%s5104_s17 + $0x8] sm:$0xff]   ;;  %v4402_v8 = vld [vmem:[%s5104_s17] sm:$0xff]   ;;  %s6473_s14 = sld [smem:[#allocation59_spill]]  ;;  %vm6404_vm12 = vsmask.f32 7424 }
  0x9d   : > { %3829 = vmatprep.subr.bf16.mxu0 %v4797_v0  ;;  %v4403_v36 = vld [vmem:[%s5110_s10 + $0x78] sm:$0xff]   ;;  %v4404_v39 = vld [vmem:[%s5110_s10 + $0x70] sm:$0xff]   ;;  %v4405_v41 = vld [vmem:[%s5110_s10 + $0x68] sm:$0xff]   ;;  %s6622_s16 = sld [smem:[#allocation61_spill]]  ;;  %s3339_s13 = sshll.u32 %s471_s18, 7 }
  0x9e   : > { %3903 = vmatprep.subr.bf16.mxu1 %v4403_v36  ;;  %v4406_v44 = vld [vmem:[%s5110_s10 + $0x60] sm:$0xff]   ;;  %v4407_v45 = vld [vmem:[%s5110_s10 + $0x138] sm:$0xff]   ;;  %v4409_v48 = vld [vmem:[%s5110_s10 + $0x130] sm:$0xff]   ;;  %s6230_s17 = scalar_lea.vmem [#allocation10], %s3339_s13  ;;  %s6623_s20 = sld [smem:[#allocation21_spill]] }
  0x9f   : > { %3904 = vmatpush3.bf16.msra.mxu1 %v4403_v36  ;;  %v4408_v47 = vld [vmem:[%s5110_s10 + $0x58] sm:$0xff]   ;;  %v4410_v51 = vld [vmem:[%s5110_s10 + $0x50] sm:$0xff]   ;;  %v4411_v52 = vld [vmem:[%s5110_s10 + $0x128] sm:$0xff]   ;;  %s6624_s29 = sld [smem:[#allocation62_spill]]  ;;  %s4799_s11 = smov [#allocation10]  }
  0xa0   : > { %3830 = vmatpush3.bf16.msra.mxu0 %v4396_v2  ;;  %s3341_s23 = smul.u32 192, %s6471_s27  ;;  %3905 = vmatprep.subr.bf16.mxu1 %v4404_v39  ;;  %v4412_v54 = vld [vmem:[%s5110_s10 + $0x48] sm:$0xff]   ;;  %v4413_v55 = vld [vmem:[%s5110_s10 + $0x120] sm:$0xff]   ;;  %v4415_v59 = vld [vmem:[%s5110_s10 + $0x118] sm:$0xff]   ;;  %s3340_s28 = sshll.u32 %s6471_s27, 3 }
  0xa1   : > { %3831 = vmatprep.subr.bf16.mxu0 %v4797_v0  ;;  %v4414_v58 = vld [vmem:[%s5110_s10 + $0x40] sm:$0xff]   ;;  %v4416_v61 = vld [vmem:[%s5110_s10 + $0x110] sm:$0xff]   ;;  %v4417_v1 = vld [vmem:[%s5110_s10 + $0x108] sm:$0xff]   ;;  %p474_p7 = scmp.lt.s32.totalorder %s6472_s0, 1 }
  0xa2   : > { %s5136_s7 = scalar_lea.vmem %s392_s21, %s3341_s23 [#allocation2]  ;;  %s6583_s21 = sld [smem:[#allocation60_spill]] }
  0xa3   : > { %v488_v9 = vld [vmem:[%s5136_s7] sm:$0xff]  ;;  %v489_v10 = vld [vmem:[%s5136_s7 + $0x8] sm:$0xff]  ;;  %v490_v12 = vld [vmem:[%s5136_s7 + $0x10] sm:$0xff]  ;;  %3906 = vmatpush3.bf16.msra.mxu1 %v4404_v39  ;;  %s5225_s24 = scalar_select %p474_p7, %s6472_s0, 1 }
  0xa4   : > { %3832 = vmatpush3.bf16.msra.mxu0 %v4397_v3  ;;  %v518_v11 = vpack.c.bf16 %v489_v10, %v488_v9  ;;  %v491_v13 = vld [vmem:[%s5136_s7 + $0x18] sm:$0xff]  ;;  %v492_v15 = vld [vmem:[%s5136_s7 + $0x20] sm:$0xff]  ;;  %v493_v16 = vld [vmem:[%s5136_s7 + $0x28] sm:$0xff]  ;;  %3907 = vmatprep.subr.bf16.mxu1 %v4405_v41  ;;  %v5232_v9 = vstv %s3340_s28  ;;  %s3636_s12 = sshll.u32 %s6623_s20, 5  ;;  %s3637_s23 = sshll.u32 %s6472_s0, 6 }
  0xa5   : > { %3833 = vmatprep.subr.bf16.mxu0 %v4797_v0  ;;  %v519_v14 = vpack.c.bf16 %v491_v13, %v490_v12  ;;  %v520_v17 = vpack.c.bf16 %v493_v16, %v492_v15  ;;  %v494_v18 = vld [vmem:[%s5136_s7 + $0x30] sm:$0xff]  ;;  %v495_v19 = vld [vmem:[%s5136_s7 + $0x38] sm:$0xff]  ;;  %v496_v21 = vld [vmem:[%s5136_s7 + $0x40] sm:$0xff]  ;;  %s476_s4 = scalar_lea.vmem %s6473_s14, %s5225_s24  ;;  %vm801_vm1 = vcmp.ge.s32.totalorder %v5232_v9, 1  ;;  %vm811_vm2 = vcmp.le.s32.totalorder %v5232_v9, 16  ;;  %s482_s26 = scalar_lea.vmem %s6622_s16, %s5225_s24 }
  0xa6   : > { %v521_v20 = vpack.c.bf16 %v495_v19, %v494_v18  ;;  %v497_v22 = vld [vmem:[%s5136_s7 + $0x48] sm:$0xff]  ;;  %v498_v24 = vld [vmem:[%s5136_s7 + $0x50] sm:$0xff]  ;;  %v499_v25 = vld [vmem:[%s5136_s7 + $0x58] sm:$0xff]  ;;  %s3131_s0 = sshll.u32 %s6230_s17, 4  ;;  %s6287_s14 = scalar_lea.sflag [#allocation4], %s471_s18  ;;  %s6281_s0 = int_to_ptr.vmem [resolvable:$true] %s3131_s0 }
  0xa7   : > { %v522_v23 = vpack.c.bf16 %v497_v22, %v496_v21  ;;  %v523_v26 = vpack.c.bf16 %v499_v25, %v498_v24  ;;  %v500_v27 = vld [vmem:[%s5136_s7 + $0x60] sm:$0xff]  ;;  %v501_v28 = vld [vmem:[%s5136_s7 + $0x68] sm:$0xff]  ;;  %v502_v30 = vld [vmem:[%s5136_s7 + $0x70] sm:$0xff]  ;;  %3908 = vmatpush3.bf16.msra.mxu1 %v4405_v41  ;;  %v788_v24 = vadd.s32 1, %v5232_v9  ;;  %s4619_s19 = scalar_lea.vmem %s6281_s0, 2048 }
  0xa8   : > { %3834 = vmatpush3.bf16.msra.mxu0 %v4398_v4  ;;  %v524_v29 = vpack.c.bf16 %v501_v28, %v500_v27  ;;  %v503_v31 = vld [vmem:[%s5136_s7 + $0x78] sm:$0xff]  ;;  %v504_v33 = vld [vmem:[%s5136_s7 + $0x80] sm:$0xff]  ;;  %v505_v34 = vld [vmem:[%s5136_s7 + $0x88] sm:$0xff]  ;;  %3909 = vmatprep.subr.bf16.mxu1 %v4406_v44  ;;  %s479_s6 = scalar_lea.vmem %s6583_s21, %s5225_s24  ;;  %p4620_p1 = scmp.ne.s32.totalorder %s6281_s0, %s4619_s19 }
  0xa9   : > { %3835 = vmatprep.subr.bf16.mxu0 %v4797_v0  ;;  %v525_v32 = vpack.c.bf16 %v503_v31, %v502_v30  ;;  %v526_v35 = vpack.c.bf16 %v505_v34, %v504_v33  ;;  %v506_v37 = vld [vmem:[%s5136_s7 + $0x90] sm:$0xff]  ;;  %v507_v38 = vld [vmem:[%s5136_s7 + $0x98] sm:$0xff]  ;;  %v508_v42 = vld [vmem:[%s5136_s7 + $0xa0] sm:$0xff]  ;;  %vm802_vm8 = vcmp.ge.s32.totalorder %v788_v24, 1  ;;  %vm812_vm9 = vcmp.le.s32.totalorder %v788_v24, 16  ;;  %s4623_s21 = sshll.u32 %s4799_s11, 4  ;;  %s4624_s21 = int_to_ptr.vmem [resolvable:$false] %s4623_s21 }
  0xaa   : > { %v527_v40 = vpack.c.bf16 %v507_v38, %v506_v37  ;;  %v509_v43 = vld [vmem:[%s5136_s7 + $0xa8] sm:$0xff]  ;;  %v510_v49 = vld [vmem:[%s5136_s7 + $0xb0] sm:$0xff]  ;;  %v511_v50 = vld [vmem:[%s5136_s7 + $0xb8] sm:$0xff]  ;;  %p4621_p4 = pnand %p4620_p1, %p5030_p6  ;;  %p4626_p0 = scmp.lt.s32.totalorder %s6281_s0, %s4624_s21 }
  0xab   : > { %v528_v46 = vpack.c.bf16 %v509_v43, %v508_v42  ;;  %3910 = vmatpush3.bf16.msra.mxu1 %v4406_v44  ;;  %v529_v53 = vpack.c.bf16 %v511_v50, %v510_v49  ;;  %v512_v56 = vld [vmem:[%s5136_s7 + $0xc0] sm:$0xff]  ;;  %v513_v57 = vld [vmem:[%s5136_s7 + $0xc8] sm:$0xff]  ;;  %v514_v62 = vld [vmem:[%s5136_s7 + $0xd0] sm:$0xff] }
  0xac   : > { %3836 = vmatpush3.bf16.msra.mxu0 %v4399_v5  ;;  %3911 = vmatprep.subr.bf16.mxu1 %v4408_v47  ;;  %v530_v60 = vpack.c.bf16 %v513_v57, %v512_v56  ;;  %v515_v63 = vld [vmem:[%s5136_s7 + $0xd8] sm:$0xff]  ;;  %v4418_v3 = vld [vmem:[%s5110_s10 + $0x100] sm:$0xff]   ;;  %v517_v5 = vld [vmem:[%s5136_s7 + $0xe8] sm:$0xff]  ;;  %p4622_p2 = pneg %p4621_p4 }
  0xad   : > { %3837 = vmatprep.subr.bf16.mxu0 %v4797_v0  ;;  %v531_v2 = vpack.c.bf16 %v515_v63, %v514_v62  ;;  %v516_v4 = vld [vmem:[%s5136_s7 + $0xe0] sm:$0xff]  ;;  %vm5241_vm3 = vmand %vm801_vm1, %vm811_vm2 }
  0xae   : > { %v5234_v10 = vld [vmem:[%s476_s4] ss:$0 sm:$0xff]  ;;  %vm5272_vm10 = vmand %vm802_vm8, %vm812_vm9  ;;  %s6625_s4 = smov %s6624_s29 }
  0xaf   : > { %3912 = vmatpush3.bf16.msra.mxu1 %v4408_v47  ;;  %v4461_v47 = vld [vmem:[%s5110_s10 + $0x168] sm:$0xff]  }
  0xb0   : > { %3838 = vmatpush3.bf16.msra.mxu0 %v4400_v6  ;;  %3913 = vmatprep.subr.bf16.mxu1 %v4410_v51  ;;  %v532_v6 = vpack.c.bf16 %v517_v5, %v516_v4 }
  0xb1   : > { %3839 = vmatprep.subr.bf16.mxu0 %v4797_v0 }
  0xb3   : > { %3914 = vmatpush3.bf16.msra.mxu1 %v4410_v51 }
  0xb4   : > { %3840 = vmatpush3.bf16.msra.mxu0 %v4401_v7  ;;  %3915 = vmatprep.subr.bf16.mxu1 %v4412_v54  ;;  %v5216_v7 = vld [vmem:[%s5110_s10 + $0x38] sm:$0xff]  }
  0xb5   : > { %3841 = vmatprep.subr.bf16.mxu0 %v4797_v0 }
  0xb7   : > { %3916 = vmatpush3.bf16.msra.mxu1 %v4412_v54 }
  0xb8   : > { %3842 = vmatpush3.bf16.msra.mxu0 %v4402_v8  ;;  %3917 = vmatprep.subr.bf16.mxu1 %v4414_v58  ;;  %v5220_v8 = vld [vmem:[%s5110_s10 + $0x1b8] sm:$0xff]  }
  0xb9   : > { %4031 = vmatprep.subr.bf16.mxu0 %v4407_v45 }
  0xbb   : > { %3844 = vmatmul.mubr.bf16.vlgmr.msra.gmra.mxu0 %v518_v11  ;;  %3918 = vmatpush3.bf16.msra.mxu1 %v4414_v58 }
  0xbc   : > { %3847 = vmatprep.mubr.msk.bf16.mxu0 %vm4798_vm0, %v4797_v0  ;;  %4032 = vmatpush3.bf16.msra.mxu0 %v4407_v45 }
  0xbd   : > { %4033 = vmatprep.subr.bf16.mxu0 %v4409_v48  ;;  %3935 = vmatprep.subr.bf16.mxu1 %v5216_v7 }
  0xc0   : > { %4034 = vmatpush3.bf16.msra.mxu0 %v4409_v48 }
  0xc1   : > { %4035 = vmatprep.subr.bf16.mxu0 %v4411_v52 }
  0xc3   : > { %3848 = vmatmul.mubr.bf16.gmra.mxu0 %v519_v14 }
  0xc4   : > { %3851 = vmatprep.mubr.msk.bf16.mxu0 %vm4798_vm0, %v4797_v0  ;;  %4036 = vmatpush3.bf16.msra.mxu0 %v4411_v52 }
  0xc5   : > { %4037 = vmatprep.subr.bf16.mxu0 %v4413_v55 }
  0xc8   : > { %4038 = vmatpush3.bf16.msra.mxu0 %v4413_v55  ;;  %v789_v55 = vadd.s32 2, %v5232_v9 }
  0xc9   : > { %4039 = vmatprep.subr.bf16.mxu0 %v4415_v59 }
  0xca   : > { %vm803_vm15 = vcmp.ge.s32.totalorder %v789_v55, 1 }
  0xcb   : > { %3852 = vmatmul.mubr.bf16.gmra.mxu0 %v520_v17 }
  0xcc   : > { %3855 = vmatprep.mubr.msk.bf16.mxu0 %vm4798_vm0, %v4797_v0  ;;  %4040 = vmatpush3.bf16.msra.mxu0 %v4415_v59 }
  0xcd   : > { %4041 = vmatprep.subr.bf16.mxu0 %v4416_v61 }
  0xd0   : > { %4042 = vmatpush3.bf16.msra.mxu0 %v4416_v61 }
  0xd1   : > { %4043 = vmatprep.subr.bf16.mxu0 %v4417_v1 }
  0xd3   : > { %3856 = vmatmul.mubr.bf16.gmra.mxu0 %v521_v20 }
  0xd4   : > { %3859 = vmatprep.mubr.msk.bf16.mxu0 %vm4798_vm0, %v4797_v0  ;;  %4044 = vmatpush3.bf16.msra.mxu0 %v4417_v1 }
  0xd5   : > { %4045 = vmatprep.subr.bf16.mxu0 %v4418_v3 }
  0xd8   : > { %4046 = vmatpush3.bf16.msra.mxu0 %v4418_v3 }
  0xd9   : > { %4095 = vmatprep.subr.bf16.mxu0 %v5220_v8 }
  0xdb   : > { %3860 = vmatmul.mubr.bf16.gmra.mxu0 %v522_v23 }
  0xdc   : > { %3863 = vmatprep.mubr.msk.bf16.mxu0 %vm4798_vm0, %v4797_v0 }
  0xe3   : > { %3864 = vmatmul.mubr.bf16.gmra.mxu0 %v523_v26 }
  0xe4   : > { %3867 = vmatprep.mubr.msk.bf16.mxu0 %vm4798_vm0, %v4797_v0 }
  0xeb   : > { %3868 = vmatmul.mubr.bf16.gmra.mxu0 %v524_v29 }
  0xec   : > { %3871 = vmatprep.mubr.msk.bf16.mxu0 %vm4798_vm0, %v4797_v0 }
  0xf3   : > { %3872 = vmatmul.mubr.bf16.gmra.mxu0 %v525_v32 }
  0xf4   : > { %3875 = vmatprep.mubr.msk.bf16.mxu0 %vm4798_vm0, %v4797_v0 }
  0xfb   : > { %3876 = vmatmul.mubr.bf16.gmra.mxu0 %v526_v35 }
  0xfc   : > { %3879 = vmatprep.mubr.msk.bf16.mxu0 %vm4798_vm0, %v4797_v0 }
 0x103   : > { %3880 = vmatmul.mubr.bf16.gmra.mxu0 %v527_v40 }
 0x104   : > { %3883 = vmatprep.mubr.msk.bf16.mxu0 %vm4798_vm0, %v4797_v0 }
 0x10b   : > { %3884 = vmatmul.mubr.bf16.gmra.mxu0 %v528_v46 }
 0x10c   : > { %3887 = vmatprep.mubr.msk.bf16.mxu0 %vm4798_vm0, %v4797_v0 }
 0x113   : > { %3888 = vmatmul.mubr.bf16.gmra.mxu0 %v529_v53 }
 0x114   : > { %3891 = vmatprep.mubr.msk.bf16.mxu0 %vm4798_vm0, %v4797_v0 }
 0x11b   : > { %3892 = vmatmul.mubr.bf16.gmra.mxu0 %v530_v60 }
 0x11c   : > { %3895 = vmatprep.mubr.msk.bf16.mxu0 %vm4798_vm0, %v4797_v0 }
 0x123   : > { %3896 = vmatmul.mubr.bf16.gmra.mxu0 %v531_v2 }
 0x124   : > { %3899 = vmatprep.mubr.msk.bf16.mxu0 %vm4798_vm0, %v4797_v0  ;;  %v797_v0 = vlaneseq  ;;  %vm813_vm0 = vcmp.le.s32.totalorder %v789_v55, 16 }
 0x125   : > { %vm5302_vm1 = vmand %vm803_vm15, %vm813_vm0 }
 0x126   : > { %v5236_v11 = vshrl.u32 %v797_v0, 7 }
 0x128   : > { %vm6407_vm4 = vcmp.ge.s32.totalorder %v5236_v11, 1  ;;  %v5247_v16 = vadd.s32 16, %v5236_v11 }
 0x129   : > { %vm5254_vm5 = vmand %vm5241_vm3, %vm6407_vm4 }
 0x12a   : > { %vm6405_vm6 = vcmp.le.s32.totalorder %v5247_v16, 16  ;;  %vm5281_vm13 = vmand %vm5272_vm10, %vm6407_vm4 }
 0x12b   : > { %3900 = vmatmul.mubr.bf16.gmra.mxu0 %v532_v6  ;;  %vm869_vm7 = vmand %vm5241_vm3, %vm6405_vm6 }
 0x12c   : > { %vm872_vm14 = vmand %vm5272_vm10, %vm6405_vm6 }
 0x12d   : > { %vm5311_vm2 = vmand %vm5302_vm1, %vm6407_vm4 }
 0x17b   : > { %v638_v12 = vpop.f32.mrf.mxu0 }
 0x17c   : > { %v639_v13 = vadd.f32 %v5234_v10, %v638_v12 }
 0x17d   : > { %v3845_v14 = vpop.f32.mrf.mxu0 }
 0x17e   : > { %v757_v18 = vmax.f32 %v639_v13, 0.0 }
 0x17f   : > { %v641_v17 = vpop.f32.mrf.mxu0 }
 0x180   : > { %v642_v19 = vadd.f32 %v5234_v10, %v641_v17  ;;  %v957_v25 = vsel %vm5254_vm5, %v757_v18, 0.0 }
 0x181   : > { %v3846_v21 = vpop.f32.mrf.mxu0 }
 0x182   : > { %v758_v22 = vmax.f32 %v642_v19, 0.0 }
 0x183   : > { %v646_v23 = vpop.f32.mrf.mxu0 }
 0x184   : > { %v958_v26 = vsel %vm5241_vm3, %v758_v22, 0.0  ;;  %v5264_v27 = vpack.c.bf16 %v758_v22, %v757_v18  ;;  %v647_v28 = vadd.f32 %v5234_v10, %v646_v23 }
 0x185   : > { %v987_v29 = vpack.c.bf16 %v958_v26, %v957_v25  ;;  %v3849_v30 = vpop.f32.mrf.mxu0 }
 0x186   : > { %v759_v31 = vmax.f32 %v647_v28, 0.0 }
 0x187   : > { %v649_v32 = vpop.f32.mrf.mxu0  ;;  %v1027_v33 = vshll.u32 %v987_v29, 16  ;;  %v1025_v42 = vshrl.u32 %v987_v29, 16  ;;  %v1452_v44 = vrot.slane %v987_v29, 1  ;;  %v4420_v29 = vld [vmem:[%s5110_s10 + $0x30] sm:$0xff]  }
 0x188   : > { %v959_v34 = vsel %vm869_vm7, %v759_v31, 0.0  ;;  %v650_v35 = vadd.f32 %v5234_v10, %v649_v32  ;;  %v790_v32 = vadd.s32 3, %v5232_v9  ;;  %vm875_vm7 = vmand %vm5302_vm1, %vm6405_vm6 }
 0x189   : > { %v988_v36 = vpack.c.bf16 %v959_v34, %v959_v34  ;;  %v3850_v37 = vpop.f32.mrf.mxu0  ;;  %v1029_v38 = vrot.slane %v1027_v33, 1 }
 0x18a   : > { %v760_v45 = vmax.f32 %v650_v35, 0.0  ;;  %vm804_vm8 = vcmp.ge.s32.totalorder %v790_v32, 1  ;;  %vm814_vm9 = vcmp.le.s32.totalorder %v790_v32, 16 }
 0x18b   : > { %v1453_v40 = vrot.slane %v988_v36, 1  ;;  %v654_v41 = vpop.f32.mrf.mxu0  ;;  %v1032_v43 = vshll.u32 %v988_v36, 16  ;;  %v1030_v49 = vor.u32 %v1029_v38, %v1025_v42 }
 0x18c   : > { %v655_v46 = vadd.f32 %v5234_v10, %v654_v41  ;;  %v960_v56 = vsel %vm5281_vm13, %v760_v45, 0.0  ;;  %v4421_v41 = vld [vmem:[%s5110_s10 + $0x28] sm:$0xff]  }
 0x18d   : > { %v3853_v48 = vpop.f32.mrf.mxu0  ;;  %v1034_v50 = vrot.slane %v1032_v43, 1  ;;  %v5286_v51 = vsel %vm6406_vm11, %v1452_v44, %v1453_v40 }
 0x18e   : > { %v761_v52 = vmax.f32 %v655_v46, 0.0 }
 0x18f   : > { %v657_v53 = vpop.f32.mrf.mxu0  ;;  %v1035_v54 = vsel %vm6404_vm12, %v1030_v49, %v1034_v50 }
 0x190   : > { %v961_v57 = vsel %vm5272_vm10, %v761_v52, 0.0  ;;  %v5294_v58 = vpack.c.bf16 %v761_v52, %v760_v45  ;;  %v658_v59 = vadd.f32 %v5234_v10, %v657_v53  ;;  %3919 = vmatprep.mubr.bf16.mxu1 %v1035_v54 }
 0x191   : > { %v989_v60 = vpack.c.bf16 %v961_v57, %v960_v56  ;;  %v3854_v61 = vpop.f32.mrf.mxu0 }
 0x192   : > { %v762_v62 = vmax.f32 %v658_v59, 0.0  ;;  %v4438_v61 = vld [vmem:[%s5110_s10 + $0xa0] sm:$0xff]  }
 0x193   : > { %v1039_v63 = vshll.u32 %v989_v60, 16  ;;  %v662_v1 = vpop.f32.mrf.mxu0  ;;  %v1455_v12 = vrot.slane %v989_v60, 1  ;;  %v1037_v18 = vshrl.u32 %v989_v60, 16 }
 0x194   : > { %v962_v2 = vsel %vm872_vm14, %v762_v62, 0.0  ;;  %v663_v3 = vadd.f32 %v5234_v10, %v662_v1  ;;  %vm5335_vm14 = vmand %vm804_vm8, %vm814_vm9 }
 0x195   : > { %v990_v4 = vpack.c.bf16 %v962_v2, %v962_v2  ;;  %v3857_v5 = vpop.f32.mrf.mxu0  ;;  %v1041_v6 = vrot.slane %v1039_v63, 1  ;;  %vm5345_vm15 = vmand %vm5335_vm14, %vm6407_vm4 }
 0x196   : > { %v763_v19 = vmax.f32 %v663_v3, 0.0  ;;  %v4424_v3 = vld [vmem:[%s5110_s10 + $0x18] sm:$0xff]   ;;  %vm878_vm0 = vmand %vm5335_vm14, %vm6405_vm6 }
 0x197   : > { %v1044_v13 = vshll.u32 %v990_v4, 16  ;;  %v1456_v14 = vrot.slane %v990_v4, 1  ;;  %v665_v17 = vpop.f32.mrf.mxu0  ;;  %v1042_v25 = vor.u32 %v1041_v6, %v1037_v18  ;;  %v4425_v4 = vld [vmem:[%s5110_s10 + $0x1b0] sm:$0xff]  }
 0x198   : > { %v666_v21 = vadd.f32 %v5234_v10, %v665_v17  ;;  %v963_v33 = vsel %vm5311_vm2, %v763_v19, 0.0 }
 0x199   : > { %v1046_v22 = vrot.slane %v1044_v13, 1  ;;  %v3858_v24 = vpop.f32.mrf.mxu0  ;;  %v5316_v26 = vsel %vm6406_vm11, %v1455_v12, %v1456_v14  ;;  %v791_v12 = vadd.s32 4, %v5232_v9 }
 0x19a   : > { %v764_v28 = vmax.f32 %v666_v21, 0.0  ;;  %v4426_v24 = vld [vmem:[%s5110_s10 + $0x10] sm:$0xff]  }
 0x19b   : > { %v670_v30 = vpop.f32.mrf.mxu0  ;;  %v1047_v31 = vsel %vm6404_vm12, %v1042_v25, %v1046_v22  ;;  %v4427_v25 = vld [vmem:[%s5110_s10 + $0x1a8] sm:$0xff]   ;;  %vm815_vm8 = vcmp.le.s32.totalorder %v791_v12, 16 }
 0x19c   : > { %v964_v34 = vsel %vm5302_vm1, %v764_v28, 0.0  ;;  %v5325_v35 = vpack.c.bf16 %v764_v28, %v763_v19  ;;  %v671_v36 = vadd.f32 %v5234_v10, %v670_v30  ;;  %3920 = vmatmul.mubr.bf16.vlgmr.msra.gmra.mxu1 %v1047_v31  ;;  %4047 = vmatprep.mubr.bf16.mxu0 %v1047_v31 }
 0x19d   : > { %v991_v37 = vpack.c.bf16 %v964_v34, %v963_v33  ;;  %v3861_v38 = vpop.f32.mrf.mxu0  ;;  %3936 = vmatpush3.bf16.msra.mxu1 %v5216_v7  ;;  %v4422_v7 = vld [vmem:[%s5110_s10 + $0x20] sm:$0xff]  }
 0x19e   : > { %v765_v40 = vmax.f32 %v671_v36, 0.0  ;;  %3937 = vmatprep.subr.bf16.mxu1 %v4420_v29  ;;  %v4428_v36 = vld [vmem:[%s5110_s10 + $0x8] sm:$0xff]  }
 0x19f   : > { %v1051_v42 = vshll.u32 %v991_v37, 16  ;;  %v673_v43 = vpop.f32.mrf.mxu0  ;;  %v1049_v55 = vshrl.u32 %v991_v37, 16  ;;  %v1458_v56 = vrot.slane %v991_v37, 1  ;;  %v4429_v37 = vld [vmem:[%s5110_s10 + $0x1a0] sm:$0xff]  }
 0x1a0   : > { %v965_v44 = vsel %vm875_vm7, %v765_v40, 0.0  ;;  %v674_v45 = vadd.f32 %v5234_v10, %v673_v43  ;;  %vm805_vm7 = vcmp.ge.s32.totalorder %v791_v12, 1  ;;  %v4433_v12 = vld [vmem:[%s5110_s10 + $0x190] sm:$0xff]  }
 0x1a1   : > { %v992_v46 = vpack.c.bf16 %v965_v44, %v965_v44  ;;  %v3862_v48 = vpop.f32.mrf.mxu0  ;;  %v1053_v49 = vrot.slane %v1051_v42, 1  ;;  %3938 = vmatpush3.bf16.msra.mxu1 %v4420_v29  ;;  %vm5377_vm9 = vmand %vm805_vm7, %vm815_vm8 }
 0x1a2   : > { %3939 = vmatprep.subr.bf16.mxu1 %v4421_v41  ;;  %v766_v57 = vmax.f32 %v674_v45, 0.0  ;;  %vm881_vm7 = vmand %vm5377_vm9, %vm6405_vm6 }
 0x1a3   : > { %v1056_v52 = vshll.u32 %v992_v46, 16  ;;  %v1459_v53 = vrot.slane %v992_v46, 1  ;;  %v678_v54 = vpop.f32.mrf.mxu0  ;;  %v1054_v63 = vor.u32 %v1053_v49, %v1049_v55  ;;  %v4431_v55 = vld [vmem:[%s5110_s10 + $0x198] sm:$0xff]  }
 0x1a4   : > { %v679_v59 = vadd.f32 %v5234_v10, %v678_v54  ;;  %v966_v13 = vsel %vm5345_vm15, %v766_v57, 0.0  ;;  %v4430_v54 = vld [vmem:[%s5110_s10] sm:$0xff]  }
 0x1a5   : > { %v1058_v60 = vrot.slane %v1056_v52, 1  ;;  %v3865_v62 = vpop.f32.mrf.mxu0  ;;  %3940 = vmatpush3.bf16.msra.mxu1 %v4421_v41  ;;  %v5350_v1 = vsel %vm6406_vm11, %v1458_v56, %v1459_v53 }
 0x1a6   : > { %v767_v2 = vmax.f32 %v679_v59, 0.0  ;;  %3941 = vmatprep.subr.bf16.mxu1 %v4422_v7  ;;  %v792_v59 = vadd.s32 5, %v5232_v9 }
 0x1a7   : > { %v681_v5 = vpop.f32.mrf.mxu0  ;;  %v5355_v6 = vsel %vm6404_vm12, %v1054_v63, %v1058_v60 }
 0x1a8   : > { %v967_v14 = vsel %vm5335_vm14, %v767_v2, 0.0  ;;  %v5362_v17 = vpack.c.bf16 %v767_v2, %v766_v57  ;;  %v682_v18 = vadd.f32 %v5234_v10, %v681_v5  ;;  %3923 = vmatprep.mubr.bf16.mxu1 %v5355_v6  ;;  %4048 = vmatmul.mubr.bf16.vlgmr.msra.gmra.mxu0 %v5355_v6  ;;  %v5421_v5 = vld [vmem:[%s5110_s10 + $0xb8] sm:$0xff]   ;;  %vm806_vm8 = vcmp.ge.s32.totalorder %v792_v59, 1 }
 0x1a9   : > { %v993_v19 = vpack.c.bf16 %v967_v14, %v966_v13  ;;  %v3866_v21 = vpop.f32.mrf.mxu0  ;;  %3942 = vmatpush3.bf16.msra.mxu1 %v4422_v7  ;;  %4096 = vmatpush3.bf16.msra.mxu0 %v5220_v8 }
 0x1aa   : > { %v768_v22 = vmax.f32 %v682_v18, 0.0  ;;  %3943 = vmatprep.subr.bf16.mxu1 %v4424_v3  ;;  %4097 = vmatprep.subr.bf16.mxu0 %v4425_v4 }
 0x1ab   : > { %v1063_v28 = vshll.u32 %v993_v19, 16  ;;  %v686_v29 = vpop.f32.mrf.mxu0  ;;  %v1061_v42 = vshrl.u32 %v993_v19, 16  ;;  %v1461_v43 = vrot.slane %v993_v19, 1 }
 0x1ac   : > { %v968_v30 = vsel %vm878_vm0, %v768_v22, 0.0  ;;  %v5375_v31 = vadd.f32 %v5234_v10, %v686_v29  ;;  %vm5391_vm0 = vmand %vm5377_vm9, %vm6407_vm4 }
 0x1ad   : > { %v994_v32 = vpack.c.bf16 %v968_v30, %v968_v30  ;;  %v3869_v33 = vpop.f32.mrf.mxu0  ;;  %v1065_v34 = vrot.slane %v1063_v28, 1  ;;  %3944 = vmatpush3.bf16.msra.mxu1 %v4424_v3  ;;  %4098 = vmatpush3.bf16.msra.mxu0 %v4425_v4  ;;  %v4435_v28 = vld [vmem:[%s5110_s10 + $0x188] sm:$0xff]  }
 0x1ae   : > { %3945 = vmatprep.subr.bf16.mxu1 %v4426_v24  ;;  %4099 = vmatprep.subr.bf16.mxu0 %v4427_v25  ;;  %v6421_v44 = vmax.f32 %v5375_v31, 0.0 }
 0x1af   : > { %v1068_v38 = vshll.u32 %v994_v32, 16  ;;  %v1462_v40 = vrot.slane %v994_v32, 1  ;;  %v689_v41 = vpop.f32.mrf.mxu0  ;;  %v1066_v7 = vor.u32 %v1065_v34, %v1061_v42 }
 0x1b0   : > { %v5385_v45 = vadd.f32 %v5234_v10, %v689_v41  ;;  %v969_v60 = vsel %vm5391_vm0, %v6421_v44, 0.0 }
 0x1b1   : > { %v1070_v46 = vrot.slane %v1068_v38, 1  ;;  %v3870_v49 = vpop.f32.mrf.mxu0  ;;  %3946 = vmatpush3.bf16.msra.mxu1 %v4426_v24  ;;  %4100 = vmatpush3.bf16.msra.mxu0 %v4427_v25  ;;  %v5396_v52 = vsel %vm6406_vm11, %v1461_v43, %v1462_v40  ;;  %v6494_v25 = vmov 0  ;;  %v6496_v40 = vmov 0 }
 0x1b2   : > { %v6420_v53 = vmax.f32 %v5385_v45, 0.0  ;;  %3947 = vmatprep.subr.bf16.mxu1 %v4428_v36  ;;  %4101 = vmatprep.subr.bf16.mxu0 %v4429_v37  ;;  %v4437_v49 = vld [vmem:[%s5110_s10 + $0x180] sm:$0xff]  }
 0x1b3   : > { %v694_v56 = vpop.f32.mrf.mxu0  ;;  %v5402_v57 = vsel %vm6404_vm12, %v1066_v7, %v1070_v46  ;;  %vm816_vm12 = vcmp.le.s32.totalorder %v792_v59, 16 }
 0x1b4   : > { %v970_v62 = vsel %vm5377_vm9, %v6420_v53, 0.0  ;;  %v695_v63 = vadd.f32 %v5234_v10, %v694_v56  ;;  %3924 = vmatmul.mubr.bf16.gmra.mxu1 %v5402_v57  ;;  %4051 = vmatprep.mubr.bf16.mxu0 %v5402_v57  ;;  %vm5427_vm6 = vmand %vm806_vm8, %vm816_vm12  ;;  %vm6499_vm8 = vcmp.le.s32.totalorder %v5247_v16, 16 }
 0x1b5   : > { %v995_v2 = vpack.c.bf16 %v970_v62, %v969_v60  ;;  %v3873_v3 = vpop.f32.mrf.mxu0  ;;  %3948 = vmatpush3.bf16.msra.mxu1 %v4428_v36  ;;  %4102 = vmatpush3.bf16.msra.mxu0 %v4429_v37  ;;  %v6495_v25 = vsel %vm5427_vm6, 4294967295, %v6494_v25  ;;  %vm5441_vm12 = vmand %vm5427_vm6, %vm6407_vm4 }
 0x1b6   : > { %v771_v4 = vmax.f32 %v695_v63, 0.0  ;;  %3949 = vmatprep.subr.bf16.mxu1 %v4430_v54  ;;  %4103 = vmatprep.subr.bf16.mxu0 %v4431_v55  ;;  %v6497_v40 = vsel %vm5441_vm12, 4294967295, %v6496_v40  ;;  %v5470_v3 = vld [vmem:[%s5110_s10 + $0x238] sm:$0xff]  }
 0x1b7   : > { %v1075_v13 = vshll.u32 %v995_v2, 16  ;;  %v697_v14 = vpop.f32.mrf.mxu0  ;;  %v1073_v33 = vshrl.u32 %v995_v2, 16  ;;  %v1464_v34 = vrot.slane %v995_v2, 1 }
 0x1b8   : > { %v971_v18 = vsel %vm881_vm7, %v771_v4, 0.0  ;;  %v5425_v19 = vadd.f32 %v5234_v10, %v697_v14  ;;  %vm6498_vm7 = vsmask.f32 7424 }
 0x1b9   : > { %v996_v21 = vpack.c.bf16 %v971_v18, %v971_v18  ;;  %v3874_v22 = vpop.f32.mrf.mxu0  ;;  %v1077_v24 = vrot.slane %v1075_v13, 1  ;;  %3950 = vmatpush3.bf16.msra.mxu1 %v4430_v54  ;;  %4104 = vmatpush3.bf16.msra.mxu0 %v4431_v55  ;;  %v793_v55 = vadd.s32 6, %v5232_v9 }
 0x1ba   : > { %3967 = vmatprep.subr.bf16.mxu1 %v5421_v5  ;;  %4105 = vmatprep.subr.bf16.mxu0 %v4433_v12  ;;  %v6419_v36 = vmax.f32 %v5425_v19, 0.0 }
 0x1bb   : > { %v1080_v29 = vshll.u32 %v996_v21, 16  ;;  %v1465_v30 = vrot.slane %v996_v21, 1  ;;  %v702_v32 = vpop.f32.mrf.mxu0  ;;  %v1078_v42 = vor.u32 %v1077_v24, %v1073_v33  ;;  %vm817_vm4 = vcmp.le.s32.totalorder %v793_v55, 16 }
 0x1bc   : > { %v5435_v37 = vadd.f32 %v5234_v10, %v702_v32  ;;  %v972_v56 = vsel %vm5441_vm12, %v6419_v36, 0.0  ;;  %v6500_v24 = vmov 0 }
 0x1bd   : > { %v1082_v38 = vrot.slane %v1080_v29, 1  ;;  %v3877_v41 = vpop.f32.mrf.mxu0  ;;  %4106 = vmatpush3.bf16.msra.mxu0 %v4433_v12  ;;  %v5446_v43 = vsel %vm6406_vm11, %v1464_v34, %v1465_v30  ;;  %vm807_vm11 = vcmp.ge.s32.totalorder %v793_v55, 1 }
 0x1be   : > { %v6417_v46 = vmax.f32 %v5435_v37, 0.0  ;;  %4107 = vmatprep.subr.bf16.mxu0 %v4435_v28  ;;  %vm5475_vm12 = vmand %vm807_vm11, %vm817_vm4  ;;  %vm6505_vm11 = vcmask 1046528  }
 0x1bf   : > { %v705_v7 = vpop.f32.mrf.mxu0  ;;  %v5451_v54 = vsel %vm6498_vm7, %v1078_v42, %v1082_v38  ;;  %vm884_vm7 = vmand %vm5427_vm6, %vm6499_vm8  ;;  %v6501_v24 = vsel %vm5475_vm12, 4294967295, %v6500_v24  ;;  %vm6502_vm8 = vcmp.ge.s32.totalorder %v5236_v11, 1  ;;  %v6503_v42 = vmov 0 }
 0x1c0   : > { %v973_v59 = vsel %vm5427_vm6, %v6417_v46, 0.0  ;;  %v706_v60 = vadd.f32 %v5234_v10, %v705_v7  ;;  %3927 = vmatprep.mubr.bf16.mxu1 %v5451_v54  ;;  %4052 = vmatmul.mubr.bf16.gmra.mxu0 %v5451_v54  ;;  %vm5488_vm4 = vmand %vm5475_vm12, %vm6502_vm8  ;;  %vm6507_vm8 = vcmp.le.s32.totalorder %v5247_v16, 16 }
 0x1c1   : > { %v997_v62 = vpack.c.bf16 %v973_v59, %v972_v56  ;;  %v3878_v63 = vpop.f32.mrf.mxu0  ;;  %4108 = vmatpush3.bf16.msra.mxu0 %v4435_v28  ;;  %v6504_v42 = vsel %vm5488_vm4, 4294967295, %v6503_v42 }
 0x1c2   : > { %v774_v2 = vmax.f32 %v706_v60, 0.0  ;;  %4109 = vmatprep.subr.bf16.mxu0 %v4437_v49 }
 0x1c3   : > { %v1087_v4 = vshll.u32 %v997_v62, 16  ;;  %v710_v12 = vpop.f32.mrf.mxu0  ;;  %v1085_v32 = vshrl.u32 %v997_v62, 16  ;;  %v1467_v33 = vrot.slane %v997_v62, 1  ;;  %v794_v62 = vadd.s32 7, %v5232_v9 }
 0x1c4   : > { %v974_v13 = vsel %vm884_vm7, %v774_v2, 0.0  ;;  %v5473_v14 = vadd.f32 %v5234_v10, %v710_v12  ;;  %vm6506_vm7 = vsmask.f32 7424 }
 0x1c5   : > { %v998_v18 = vpack.c.bf16 %v974_v13, %v974_v13  ;;  %v3881_v21 = vpop.f32.mrf.mxu0  ;;  %v1089_v22 = vrot.slane %v1087_v4, 1  ;;  %4110 = vmatpush3.bf16.msra.mxu0 %v4437_v49 }
 0x1c6   : > { %4159 = vmatprep.subr.bf16.mxu0 %v5470_v3  ;;  %v6416_v34 = vmax.f32 %v5473_v14, 0.0 }
 0x1c7   : > { %v1092_v28 = vshll.u32 %v998_v18, 16  ;;  %v1468_v29 = vrot.slane %v998_v18, 1  ;;  %v713_v30 = vpop.f32.mrf.mxu0  ;;  %v1090_v7 = vor.u32 %v1089_v22, %v1085_v32 }
 0x1c8   : > { %v5482_v38 = vadd.f32 %v5234_v10, %v713_v30  ;;  %v975_v63 = vsel %vm5488_vm4, %v6416_v34, 0.0  ;;  %vm818_vm4 = vcmp.le.s32.totalorder %v794_v62, 16 }
 0x1c9   : > { %v1094_v41 = vrot.slane %v1092_v28, 1  ;;  %v3882_v49 = vpop.f32.mrf.mxu0  ;;  %v5493_v55 = vsel %vm6505_vm11, %v1467_v33, %v1468_v29  ;;  %vm887_vm11 = vmand %vm5475_vm12, %vm6507_vm8  ;;  %vm6510_vm8 = vcmp.ge.s32.totalorder %v5236_v11, 1 }
 0x1ca   : > { %v6415_v56 = vmax.f32 %v5482_v38, 0.0 }
 0x1cb   : > { %v718_v59 = vpop.f32.mrf.mxu0  ;;  %v5497_v60 = vsel %vm6506_vm7, %v1090_v7, %v1094_v41  ;;  %vm808_vm7 = vcmp.ge.s32.totalorder %v794_v62, 1  ;;  %v6508_v41 = vmov 0 }
 0x1cc   : > { %v976_v2 = vsel %vm5475_vm12, %v6415_v56, 0.0  ;;  %v719_v4 = vadd.f32 %v5234_v10, %v718_v59  ;;  %3928 = vmatmul.mubr.bf16.gmra.mxu1 %v5497_v60  ;;  %4055 = vmatprep.mubr.bf16.mxu0 %v5497_v60  ;;  %vm5518_vm6 = vmand %vm808_vm7, %vm818_vm4  ;;  %vm6513_vm4 = vcmask 1046528   ;;  %vm6514_vm7 = vsmask.f32 7424 }
 0x1cd   : > { %v999_v12 = vpack.c.bf16 %v976_v2, %v975_v63  ;;  %v3885_v13 = vpop.f32.mrf.mxu0  ;;  %v6509_v41 = vsel %vm5518_vm6, 4294967295, %v6508_v41 }
 0x1ce   : > { %v777_v18 = vmax.f32 %v719_v4, 0.0 }
 0x1cf   : > { %v1099_v21 = vshll.u32 %v999_v12, 16  ;;  %v721_v22 = vpop.f32.mrf.mxu0  ;;  %v1097_v63 = vshrl.u32 %v999_v12, 16  ;;  %v1470_v2 = vrot.slane %v999_v12, 1 }
 0x1d0   : > { %v977_v28 = vsel %vm887_vm11, %v777_v18, 0.0  ;;  %v5516_v29 = vadd.f32 %v5234_v10, %v721_v22  ;;  %vm5530_vm11 = vmand %vm5518_vm6, %vm6510_vm8  ;;  %v6511_v18 = vmov 0  ;;  %vm6515_vm8 = vcmp.le.s32.totalorder %v5247_v16, 16 }
 0x1d1   : > { %v1000_v30 = vpack.c.bf16 %v977_v28, %v977_v28  ;;  %v3886_v32 = vpop.f32.mrf.mxu0  ;;  %v1101_v33 = vrot.slane %v1099_v21, 1  ;;  %v6512_v18 = vsel %vm5530_vm11, 4294967295, %v6511_v18  ;;  %v795_v28 = vadd.s32 8, %v5232_v9 }
 0x1d2   : > { %v6412_v4 = vmax.f32 %v5516_v29, 0.0 }
 0x1d3   : > { %v1104_v49 = vshll.u32 %v1000_v30, 16  ;;  %v1471_v7 = vrot.slane %v1000_v30, 1  ;;  %v726_v59 = vpop.f32.mrf.mxu0  ;;  %v1102_v22 = vor.u32 %v1101_v33, %v1097_v63 }
 0x1d4   : > { %v5524_v62 = vadd.f32 %v5234_v10, %v726_v59  ;;  %v978_v59 = vsel %vm5530_vm11, %v6412_v4, 0.0  ;;  %vm819_vm11 = vcmp.le.s32.totalorder %v795_v28, 16 }
 0x1d5   : > { %v1106_v13 = vrot.slane %v1104_v49, 1  ;;  %v3889_v21 = vpop.f32.mrf.mxu0  ;;  %v5536_v12 = vsel %vm6513_vm4, %v1470_v2, %v1471_v7  ;;  %vm890_vm4 = vmand %vm5518_vm6, %vm6515_vm8  ;;  %vm6518_vm8 = vcmp.ge.s32.totalorder %v5236_v11, 1 }
 0x1d6   : > { %v6413_v30 = vmax.f32 %v5524_v62, 0.0 }
 0x1d7   : > { %v729_v32 = vpop.f32.mrf.mxu0  ;;  %v5540_v49 = vsel %vm6514_vm7, %v1102_v22, %v1106_v13  ;;  %vm809_vm7 = vcmp.ge.s32.totalorder %v795_v28, 1  ;;  %v4470_v28 = vld [vmem:[%s5110_s10 + $0x1e0] sm:$0xff]  }
 0x1d8   : > { %v979_v33 = vsel %vm5518_vm6, %v6413_v30, 0.0  ;;  %v730_v63 = vadd.f32 %v5234_v10, %v729_v32  ;;  %3931 = vmatprep.mubr.bf16.mxu1 %v5540_v49  ;;  %4056 = vmatmul.mubr.bf16.gmra.mxu0 %v5540_v49  ;;  %vm5560_vm12 = vmand %vm809_vm7, %vm819_vm11  ;;  %vm6521_vm11 = vcmask 1046528   ;;  %vm6522_vm7 = vsmask.f32 7424  ;;  %v4469_v32 = vld [vmem:[%s5110_s10 + $0x1e8] sm:$0xff]  }
 0x1d9   : > { %v1001_v7 = vpack.c.bf16 %v979_v33, %v978_v59  ;;  %v3890_v2 = vpop.f32.mrf.mxu0  ;;  %vm5569_vm6 = vmand %vm5560_vm12, %vm6518_vm8 }
 0x1da   : > { %v780_v13 = vmax.f32 %v730_v63, 0.0 }
 0x1db   : > { %v1111_v21 = vshll.u32 %v1001_v7, 16  ;;  %v734_v22 = vpop.f32.mrf.mxu0 }
 0x1dc   : > { %v980_v4 = vsel %vm890_vm4, %v780_v13, 0.0  ;;  %v5558_v30 = vadd.f32 %v5234_v10, %v734_v22  ;;  %v1109_v13 = vshrl.u32 %v1001_v7, 16  ;;  %v1473_v22 = vrot.slane %v1001_v7, 1  ;;  %vm3383_vm4 = vmpackc.low %vm5241_vm3, %vm5254_vm5 }
 0x1dd   : > { %v1002_v59 = vpack.c.bf16 %v980_v4, %v980_v4  ;;  %v3893_v33 = vpop.f32.mrf.mxu0  ;;  %v1113_v56 = vrot.slane %v1111_v21, 1  ;;  %vm6523_vm3 = vcmp.le.s32.totalorder %v5247_v16, 16 }
 0x1de   : > { %v781_v34 = vmax.f32 %v5558_v30, 0.0  ;;  %vm893_vm5 = vmand %vm5560_vm12, %vm6523_vm3  ;;  %v4453_v30 = vld [vmem:[%s5110_s10 + $0x200] sm:$0xff]  }
 0x1df   : > { %v1116_v46 = vshll.u32 %v1002_v59, 16  ;;  %v1474_v2 = vrot.slane %v1002_v59, 1  ;;  %v737_v63 = vpop.f32.mrf.mxu0  ;;  %v1114_v33 = vor.u32 %v1113_v56, %v1109_v13  ;;  %v796_v56 = vadd.s32 9, %v5232_v9 }
 0x1e0   : > { %v5574_v36 = vadd.f32 %v5234_v10, %v737_v63  ;;  %v981_v59 = vsel %vm5569_vm6, %v781_v34, 0.0 }
 0x1e1   : > { %v1118_v4 = vrot.slane %v1116_v46, 1  ;;  %v3894_v21 = vpop.f32.mrf.mxu0  ;;  %v5577_v53 = vsel %vm6521_vm11, %v1473_v22, %v1474_v2  ;;  %vm810_vm8 = vcmp.ge.s32.totalorder %v796_v56, 1  ;;  %vm820_vm11 = vcmp.le.s32.totalorder %v796_v56, 16 }
 0x1e2   : > { %v782_v44 = vmax.f32 %v5574_v36, 0.0  ;;  %vm5626_vm3 = vmand %vm810_vm8, %vm820_vm11  ;;  %vm6534_vm11 = vcmp.le.s32.totalorder %v5247_v16, 16  ;;  %v6538_v16 = vmax.f32 %v5385_v45, 0.0  ;;  %v4440_v45 = vld [vmem:[%s5110_s10 + $0x98] sm:$0xff]  }
 0x1e3   : > { %v742_v7 = vpop.f32.mrf.mxu0  ;;  %v5589_v46 = vsel %vm6522_vm7, %v1114_v33, %v1118_v4  ;;  %vm3386_vm7 = vmpackc.low %vm5272_vm10, %vm5281_vm13 }
 0x1e4   : > { %v982_v2 = vsel %vm5560_vm12, %v782_v44, 0.0  ;;  %v743_v63 = vadd.f32 %v5234_v10, %v742_v7  ;;  %3932 = vmatmul.mubr.bf16.gmra.mxu1 %v5589_v46  ;;  %4059 = vmatprep.mubr.bf16.mxu0 %v5589_v46  ;;  %vm5667_vm8 = vmpackc.low %vm5335_vm14, %vm5345_vm15 }
 0x1e5   : > { %v5599_v20 = vpack.c.bf16 %v982_v2, %v981_v59  ;;  %3951 = vmatprep.mubr.msk.bf16.mxu1 %vm3383_vm4, %v5264_v27  ;;  %v3897_v9 = vpop.f32.mrf.mxu0  ;;  %vm5621_vm4 = vmpackc.low %vm5302_vm1, %vm5311_vm2  ;;  %v4434_v2 = vld [vmem:[%s5110_s10 + $0xb0] sm:$0xff]   ;;  %vm6528_vm1 = vcmp.ge.s32.totalorder %v5236_v11, 1  ;;  %v4465_v27 = vld [vmem:[%s5110_s10 + $0x148] sm:$0xff]  }
 0x1e6   : > { %v783_v15 = vmax.f32 %v743_v63, 0.0  ;;  %vm5649_vm2 = vmand %vm5626_vm3, %vm6528_vm1  ;;  %v4455_v63 = vld [vmem:[%s5110_s10 + $0xd8] sm:$0xff]  }
 0x1e7   : > { %v1843_v13 = vshll.u32 %v5599_v20, 16  ;;  %v1841_v22 = vshrl.u32 %v5599_v20, 16  ;;  %v745_v4 = vpop.f32.mrf.mxu0  ;;  %vm896_vm14 = vmand %vm5626_vm3, %vm6534_vm11  ;;  %vm6546_vm11 = vnez %v6501_v24  ;;  %v4445_v24 = vld [vmem:[%s5110_s10 + $0x220] sm:$0xff]  }
 0x1e8   : > { %v983_v21 = vsel %vm893_vm5, %v783_v15, 0.0  ;;  %v5613_v33 = vadd.f32 %v5234_v10, %v745_v4  ;;  %vm6531_vm5 = vsmask.f32 7424  ;;  %vm5689_vm15 = vmpackc.low %vm5377_vm9, %vm5391_vm0  ;;  %vm6539_vm9 = vnez %v6497_v40  ;;  %v4442_v40 = vld [vmem:[%s5110_s10 + $0x90] sm:$0xff]  }
 0x1e9   : > { %v5615_v59 = vpack.c.bf16 %v983_v21, %v983_v21  ;;  %v1845_v7 = vrot.slane %v1843_v13, 1  ;;  %v3898_v56 = vpop.f32.mrf.mxu0  ;;  %vm6540_vm0 = vnez %v6495_v25 }
 0x1ea   : > { %v6422_v0 = vmax.f32 %v5613_v33, 0.0  ;;  %vm5723_vm1 = vmpackc.low %vm6540_vm0, %vm6539_vm9  ;;  %vm6551_vm9 = vsmask.f32 7424  ;;  %vm6552_vm0 = vnez %v6512_v18  ;;  %v6558_v36 = vmax.f32 %v5613_v33, 0.0  ;;  %v4452_v18 = vld [vmem:[%s5110_s10 + $0xe8] sm:$0xff]   ;;  %v4454_v33 = vld [vmem:[%s5110_s10 + $0xe0] sm:$0xff]  }
 0x1eb   : > { %v1848_v9 = vshll.u32 %v5615_v59, 16  ;;  %v1846_v15 = vor.u32 %v1845_v7, %v1841_v22  ;;  %v750_v4 = vpop.f32.mrf.mxu0  ;;  %v4436_v7 = vld [vmem:[%s5110_s10 + $0xa8] sm:$0xff]  }
 0x1ec   : > { %3952 = vmatmul.mubr.msk.bf16.vlgmr.msra.gmra.mxu1 %vm3386_vm7, %v5294_v58  ;;  %v5639_v23 = vadd.f32 %v5234_v10, %v750_v4  ;;  %v4457_v22 = vld [vmem:[%s5110_s10 + $0xc8] sm:$0xff]   ;;  %v4466_v4 = vld [vmem:[%s5110_s10 + $0x140] sm:$0xff]  }
 0x1ed   : > { %v1850_v13 = vrot.slane %v1848_v9, 1  ;;  %3968 = vmatpush3.bf16.msra.mxu1 %v5421_v5  ;;  %3955 = vmatprep.mubr.msk.bf16.mxu1 %vm5621_vm4, %v5325_v35  ;;  %v3901_v21 = vpop.f32.mrf.mxu0  ;;  %v984_v5 = vsel %vm5649_vm2, %v6422_v0, 0.0 }
 0x1ee   : > { %3969 = vmatprep.subr.bf16.mxu1 %v4434_v2  ;;  %v785_v56 = vmax.f32 %v5639_v23, 0.0  ;;  %v4456_v23 = vld [vmem:[%s5110_s10 + $0xd0] sm:$0xff]  }
 0x1ef   : > { %v5660_v9 = vsel %vm6531_vm5, %v1846_v15, %v1850_v13  ;;  %v753_v11 = vpop.f32.mrf.mxu0  ;;  %v6537_v13 = vmax.f32 %v5375_v31, 0.0  ;;  %vm6545_vm5 = vnez %v6504_v42  ;;  %v6556_v42 = vmax.f32 %v5516_v29, 0.0 }
 0x1f0   : > { %4060 = vmatmul.mubr.bf16.gmra.mxu0 %v5660_v9  ;;  %v985_v21 = vsel %vm5626_vm3, %v785_v56, 0.0  ;;  %v754_v0 = vadd.f32 %v5234_v10, %v753_v11  ;;  %v5790_v29 = vpack.c.bf16 %v782_v44, %v781_v34  ;;  %v4451_v44 = vld [vmem:[%s5110_s10 + $0x208] sm:$0xff]   ;;  %v3573_v34 = vpack.c.bf16 %v785_v56, %v6558_v36  ;;  %v4458_v56 = vld [vmem:[%s5110_s10 + $0xc0] sm:$0xff]   ;;  %v4468_v10 = vld [vmem:[%s5110_s10 + $0x1f0] sm:$0xff]  }
 0x1f1   : > { %3970 = vmatpush3.bf16.msra.mxu1 %v4434_v2  ;;  %4111 = vmatprep.mubr.msk.bf16.mxu0 %vm5621_vm4, %v5325_v35  ;;  %v5679_v15 = vpack.c.bf16 %v985_v21, %v984_v5  ;;  %v3902_v50 = vpop.f32.mrf.mxu0  ;;  %v5698_v5 = vpack.c.bf16 %v6538_v16, %v6537_v13  ;;  %v6543_v16 = vmax.f32 %v5425_v19, 0.0  ;;  %v6550_v19 = vmax.f32 %v5482_v38, 0.0 }
 0x1f2   : > { %3971 = vmatprep.subr.bf16.mxu1 %v4436_v7  ;;  %v786_v2 = vmax.f32 %v754_v0, 0.0  ;;  %v4441_v0 = vld [vmem:[%s5110_s10 + $0x230] sm:$0xff]  }
 0x1f3   : > { %v2396_v11 = vshll.u32 %v5679_v15, 16  ;;  %v2394_v21 = vshrl.u32 %v5679_v15, 16  ;;  %v2586_v39 = vrot.slane %v5679_v15, 1  ;;  %v4467_v15 = vld [vmem:[%s5110_s10 + $0x1f8] sm:$0xff]  }
 0x1f4   : > { %3956 = vmatmul.mubr.msk.bf16.gmra.mxu1 %vm5667_vm8, %v5362_v17  ;;  %v986_v8 = vsel %vm896_vm14, %v786_v2, 0.0  ;;  %vm5738_vm14 = vmpackc.low %vm6546_vm11, %vm6545_vm5  ;;  %vm6553_vm5 = vnez %v6509_v41  ;;  %v4448_v41 = vld [vmem:[%s5110_s10 + $0xf8] sm:$0xff]  }
 0x1f5   : > { %3972 = vmatpush3.bf16.msra.mxu1 %v4436_v7  ;;  %3959 = vmatprep.mubr.msk.bf16.mxu1 %vm5689_vm15, %v5698_v5  ;;  %v5708_v48 = vpack.c.bf16 %v986_v8, %v986_v8  ;;  %v2398_v31 = vrot.slane %v2396_v11, 1  ;;  %v6544_v11 = vmax.f32 %v5435_v37, 0.0  ;;  %v4443_v8 = vld [vmem:[%s5110_s10 + $0x228] sm:$0xff]   ;;  %vm5771_vm11 = vmpackc.low %vm6553_vm5, %vm6552_vm0 }
 0x1f6   : > { %3973 = vmatprep.subr.bf16.mxu1 %v4438_v61  ;;  %vm3572_vm0 = vmpackc.low %vm5626_vm3, %vm5649_vm2  ;;  %vm6559_vm3 = vcmask 1046528  }
 0x1f7   : > { %v2401_v50 = vshll.u32 %v5708_v48, 16  ;;  %v2399_v13 = vor.u32 %v2398_v31, %v2394_v21  ;;  %v5731_v21 = vpack.c.bf16 %v6544_v11, %v6543_v16  ;;  %v6557_v31 = vmax.f32 %v5524_v62, 0.0  ;;  %v4449_v62 = vld [vmem:[%s5110_s10 + $0x210] sm:$0xff]   ;;  %v4459_v16 = vld [vmem:[%s5110_s10 + $0x178] sm:$0xff]   ;;  %vm6560_vm10 = vmmov %vm6559_vm3 }
 0x1f8   : > { %4112 = vmatmul.mubr.msk.bf16.vlgmr.msra.gmra.mxu0 %vm5667_vm8, %v5362_v17  ;;  %vm6607_vm13 = vmmov %vm6559_vm3 }
 0x1f9   : > { %3974 = vmatpush3.bf16.msra.mxu1 %v4438_v61  ;;  %4115 = vmatprep.mubr.msk.bf16.mxu0 %vm5689_vm15, %v5698_v5  ;;  %v2403_v2 = vrot.slane %v2401_v50, 1  ;;  %v6549_v61 = vmax.f32 %v5473_v14, 0.0  ;;  %v4444_v14 = vld [vmem:[%s5110_s10 + $0x88] sm:$0xff]   ;;  %v4447_v50 = vld [vmem:[%s5110_s10 + $0x218] sm:$0xff]   ;;  %vm6611_vm2 = vmmov %vm6559_vm3 }
 0x1fa   : > { %4160 = vmatpush3.bf16.msra.mxu0 %v5470_v3  ;;  %3975 = vmatprep.subr.bf16.mxu1 %v4440_v45 }
 0x1fb   : > { %v5747_v37 = vpack.c.bf16 %v6550_v19, %v6549_v61  ;;  %4161 = vmatprep.subr.bf16.mxu0 %v4441_v0  ;;  %v5751_v3 = vsel %vm6551_vm9, %v2399_v13, %v2403_v2  ;;  %vm3476_vm9 = vmpackc.low %vm5560_vm12, %vm5569_vm6  ;;  %v2034_v13 = vrot.slane %v5615_v59, 1  ;;  %v2033_v2 = vrot.slane %v5599_v20, 1  ;;  %v4460_v20 = vld [vmem:[%s5110_s10 + $0x170] sm:$0xff]  }
 0x1fc   : > { %3960 = vmatmul.mubr.msk.bf16.gmra.mxu1 %vm5723_vm1, %v5731_v21  ;;  %v2587_v59 = vrot.slane %v5708_v48, 1  ;;  %v4462_v48 = vld [vmem:[%s5110_s10 + $0x160] sm:$0xff]   ;;  %v4476_v61 = vld [vmem:[%s5112_s9 + $0x30] sm:$0xff]   ;;  %vm6606_vm6 = vmmov %vm6559_vm3 }
 0x1fd   : > { %3976 = vmatpush3.bf16.msra.mxu1 %v4440_v45  ;;  %3963 = vmatprep.mubr.msk.bf16.mxu1 %vm5738_vm14, %v5747_v37  ;;  %v5779_v45 = vpack.c.bf16 %v6557_v31, %v6556_v42  ;;  %v5847_v11 = vsel %vm6559_vm3, %v2033_v2, %v2034_v13  ;;  %v4478_v42 = vld [vmem:[%s5112_s9 + $0x20] sm:$0xff]   ;;  %vm6608_vm12 = vmmov %vm6559_vm3 }
 0x1fe   : > { %4162 = vmatpush3.bf16.msra.mxu0 %v4441_v0  ;;  %3977 = vmatprep.subr.bf16.mxu1 %v4442_v40  ;;  %v4446_v0 = vld [vmem:[%s5110_s10 + $0x80] sm:$0xff]  }
 0x1ff   : > { %4163 = vmatprep.subr.bf16.mxu0 %v4443_v8 }
 0x200   : > { %4116 = vmatmul.mubr.msk.bf16.gmra.mxu0 %vm5723_vm1, %v5731_v21 }
 0x201   : > { %3978 = vmatpush3.bf16.msra.mxu1 %v4442_v40  ;;  %4119 = vmatprep.mubr.msk.bf16.mxu0 %vm5738_vm14, %v5747_v37 }
 0x202   : > { %4164 = vmatpush3.bf16.msra.mxu0 %v4443_v8  ;;  %3979 = vmatprep.subr.bf16.mxu1 %v4444_v14 }
 0x203   : > { %4165 = vmatprep.subr.bf16.mxu0 %v4445_v24 }
 0x204   : > { %3964 = vmatmul.mubr.msk.bf16.gmra.mxu1 %vm5771_vm11, %v5779_v45 }
 0x205   : > { %3980 = vmatpush3.bf16.msra.mxu1 %v4444_v14  ;;  %3983 = vmatprep.mubr.bf16.mxu1 %v5286_v51  ;;  %v4450_v51 = vld [vmem:[%s5110_s10 + $0xf0] sm:$0xff]  }
 0x206   : > { %4166 = vmatpush3.bf16.msra.mxu0 %v4445_v24  ;;  %3981 = vmatprep.subr.bf16.mxu1 %v4446_v0 }
 0x207   : > { %4167 = vmatprep.subr.bf16.mxu0 %v4447_v50 }
 0x208   : > { %4120 = vmatmul.mubr.msk.bf16.gmra.mxu0 %vm5771_vm11, %v5779_v45 }
 0x209   : > { %3982 = vmatpush3.bf16.msra.mxu1 %v4446_v0  ;;  %4123 = vmatprep.mubr.msk.bf16.mxu0 %vm3476_vm9, %v5790_v29 }
 0x20a   : > { %4168 = vmatpush3.bf16.msra.mxu0 %v4447_v50  ;;  %3999 = vmatprep.subr.bf16.mxu1 %v4448_v41  ;;  %v4479_v50 = vld [vmem:[%s5112_s9 + $0x18] sm:$0xff]  }
 0x20b   : > { %4169 = vmatprep.subr.bf16.mxu0 %v4449_v62 }
 0x20c   : > { %3984 = vmatmul.mubr.bf16.vlgmr.msra.gmra.mxu1 %v5316_v26 }
 0x20d   : > { %4000 = vmatpush3.bf16.msra.mxu1 %v4448_v41  ;;  %3987 = vmatprep.mubr.bf16.mxu1 %v5350_v1 }
 0x20e   : > { %4170 = vmatpush3.bf16.msra.mxu0 %v4449_v62  ;;  %4001 = vmatprep.subr.bf16.mxu1 %v4450_v51 }
 0x20f   : > { %4171 = vmatprep.subr.bf16.mxu0 %v4451_v44 }
 0x210   : > { %4124 = vmatmul.mubr.msk.bf16.gmra.mxu0 %vm3572_vm0, %v3573_v34 }
 0x211   : > { %4002 = vmatpush3.bf16.msra.mxu1 %v4450_v51  ;;  %4175 = vmatprep.mubr.bf16.mxu0 %v5350_v1  ;;  %v4480_v51 = vld [vmem:[%s5112_s9 + $0x10] sm:$0xff]  }
 0x212   : > { %4172 = vmatpush3.bf16.msra.mxu0 %v4451_v44  ;;  %4003 = vmatprep.subr.bf16.mxu1 %v4452_v18 }
 0x213   : > { %4173 = vmatprep.subr.bf16.mxu0 %v4453_v30 }
 0x214   : > { %3988 = vmatmul.mubr.bf16.gmra.mxu1 %v5396_v52 }
 0x215   : > { %4004 = vmatpush3.bf16.msra.mxu1 %v4452_v18  ;;  %3991 = vmatprep.mubr.bf16.mxu1 %v5446_v43 }
 0x216   : > { %4174 = vmatpush3.bf16.msra.mxu0 %v4453_v30  ;;  %4005 = vmatprep.subr.bf16.mxu1 %v4454_v33 }
 0x219   : > { %4006 = vmatpush3.bf16.msra.mxu1 %v4454_v33  ;;  %4176 = vmatmul.mubr.bf16.vlgmr.msra.gmra.mxu0 %v5396_v52 }
 0x21a   : > { %4179 = vmatprep.mubr.bf16.mxu0 %v5446_v43  ;;  %4007 = vmatprep.subr.bf16.mxu1 %v4455_v63 }
 0x21c   : > { %3992 = vmatmul.mubr.bf16.gmra.mxu1 %v5493_v55 }
 0x21d   : > { %4008 = vmatpush3.bf16.msra.mxu1 %v4455_v63  ;;  %3995 = vmatprep.mubr.bf16.mxu1 %v5536_v12  ;;  %v4481_v63 = vld [vmem:[%s5112_s9 + $0x8] sm:$0xff]  }
 0x21e   : > { %4009 = vmatprep.subr.bf16.mxu1 %v4456_v23 }
 0x221   : > { %4010 = vmatpush3.bf16.msra.mxu1 %v4456_v23  ;;  %4180 = vmatmul.mubr.bf16.gmra.mxu0 %v5493_v55 }
 0x222   : > { %4183 = vmatprep.mubr.bf16.mxu0 %v5536_v12  ;;  %4011 = vmatprep.subr.bf16.mxu1 %v4457_v22 }
 0x224   : > { %3996 = vmatmul.mubr.bf16.gmra.mxu1 %v5577_v53 }
 0x225   : > { %4012 = vmatpush3.bf16.msra.mxu1 %v4457_v22  ;;  %4015 = vmatprep.mubr.msk.bf16.mxu1 %vm3386_vm7, %v5294_v58  ;;  %v2588_v58 = vsel %vm6560_vm10, %v2586_v39, %v2587_v59  ;;  %vm6609_vm7 = vmmov %vm6559_vm3 }
 0x226   : > { %4013 = vmatprep.subr.bf16.mxu1 %v4458_v56 }
 0x229   : > { %4014 = vmatpush3.bf16.msra.mxu1 %v4458_v56  ;;  %4184 = vmatmul.mubr.bf16.gmra.mxu0 %v5577_v53 }
 0x22a   : > { %4063 = vmatprep.subr.bf16.mxu1 %v4459_v16  ;;  %4187 = vmatprep.mubr.bf16.mxu0 %v5847_v11 }
 0x22c   : > { %4016 = vmatmul.mubr.msk.bf16.vlgmr.msra.gmra.mxu1 %vm5621_vm4, %v5325_v35  ;;  %v4463_v35 = vld [vmem:[%s5110_s10 + $0x158] sm:$0xff]   ;;  %vm6610_vm4 = vmmov %vm6559_vm3 }
 0x22d   : > { %4064 = vmatpush3.bf16.msra.mxu1 %v4459_v16  ;;  %4019 = vmatprep.mubr.msk.bf16.mxu1 %vm5667_vm8, %v5362_v17  ;;  %v4464_v17 = vld [vmem:[%s5110_s10 + $0x150] sm:$0xff]   ;;  %v4482_v16 = vld [vmem:[%s5112_s9] sm:$0xff]   ;;  %vm6612_vm8 = vmmov %vm6611_vm2 }
 0x22e   : > { %4065 = vmatprep.subr.bf16.mxu1 %v4460_v20 }
 0x231   : > { %4066 = vmatpush3.bf16.msra.mxu1 %v4460_v20  ;;  %4188 = vmatmul.mubr.bf16.gmra.mxu0 %v2588_v58 }
 0x232   : > { %4067 = vmatprep.subr.bf16.mxu1 %v4461_v47 }
 0x234   : > { %4020 = vmatmul.mubr.msk.bf16.gmra.mxu1 %vm5689_vm15, %v5698_v5  ;;  %v4474_v5 = vld [vmem:[%s5110_s10 + $0x1c0] sm:$0xff]   ;;  %vm6613_vm15 = vmmov %vm6611_vm2 }
 0x235   : > { %4068 = vmatpush3.bf16.msra.mxu1 %v4461_v47  ;;  %4023 = vmatprep.mubr.msk.bf16.mxu1 %vm5723_vm1, %v5731_v21  ;;  %vm6614_vm1 = vmmov %vm6611_vm2 }
 0x236   : > { %4069 = vmatprep.subr.bf16.mxu1 %v4462_v48  ;;  %vm6616_vm5 = vmmov %vm6614_vm1 }
 0x237   : > { %vm6619_vm0 = vmmov %vm6614_vm1 }
 0x238   : > { %vm6620_vm3 = vmmov %vm6619_vm0 }
 0x239   : > { %4070 = vmatpush3.bf16.msra.mxu1 %v4462_v48  ;;  %vm6621_vm10 = vmmov %vm6619_vm0 }
 0x23a   : > { %4071 = vmatprep.subr.bf16.mxu1 %v4463_v35 }
 0x23c   : > { %4024 = vmatmul.mubr.msk.bf16.gmra.mxu1 %vm5738_vm14, %v5747_v37  ;;  %vm6615_vm14 = vmmov %vm6614_vm1 }
 0x23d   : > { %4072 = vmatpush3.bf16.msra.mxu1 %v4463_v35  ;;  %4027 = vmatprep.mubr.msk.bf16.mxu1 %vm5771_vm11, %v5779_v45  ;;  %vm6617_vm11 = vmmov %vm6614_vm1 }
 0x23e   : > { %4073 = vmatprep.subr.bf16.mxu1 %v4464_v17 }
 0x241   : > { %4074 = vmatpush3.bf16.msra.mxu1 %v4464_v17 }
 0x242   : > { %4075 = vmatprep.subr.bf16.mxu1 %v4465_v27 }
 0x244   : > { %4028 = vmatmul.mubr.msk.bf16.gmra.mxu1 %vm3476_vm9, %v5790_v29  ;;  %vm6618_vm9 = vmmov %vm6614_vm1 }
 0x245   : > { %4076 = vmatpush3.bf16.msra.mxu1 %v4465_v27  ;;  %4079 = vmatprep.mubr.bf16.mxu1 %v5316_v26  ;;  %v4471_v26 = vld [vmem:[%s5110_s10 + $0x1d8] sm:$0xff]  }
 0x246   : > { %4077 = vmatprep.subr.bf16.mxu1 %v4466_v4 }
 0x249   : > { %4078 = vmatpush3.bf16.msra.mxu1 %v4466_v4 }
 0x24a   : > { %4127 = vmatprep.subr.bf16.mxu1 %v4467_v15 }
 0x24c   : > { %4080 = vmatmul.mubr.bf16.vlgmr.msra.gmra.mxu1 %v5350_v1  ;;  %v4472_v1 = vld [vmem:[%s5110_s10 + $0x1d0] sm:$0xff]  }
 0x24d   : > { %4128 = vmatpush3.bf16.msra.mxu1 %v4467_v15  ;;  %4083 = vmatprep.mubr.bf16.mxu1 %v5396_v52  ;;  %v4473_v52 = vld [vmem:[%s5110_s10 + $0x1c8] sm:$0xff]   ;;  %s3643_s10 = sshll.u32 %s6471_s27, 4 }
 0x24e   : > { %4129 = vmatprep.subr.bf16.mxu1 %v4468_v10 }
 0x251   : > { %4130 = vmatpush3.bf16.msra.mxu1 %v4468_v10 }
 0x252   : > { %4131 = vmatprep.subr.bf16.mxu1 %v4469_v32 }
 0x254   : > { %4084 = vmatmul.mubr.bf16.gmra.mxu1 %v5446_v43 }
 0x255   : > { %4132 = vmatpush3.bf16.msra.mxu1 %v4469_v32  ;;  %4087 = vmatprep.mubr.bf16.mxu1 %v5493_v55 }
 0x256   : > { %4133 = vmatprep.subr.bf16.mxu1 %v4470_v28 }
 0x259   : > { %4134 = vmatpush3.bf16.msra.mxu1 %v4470_v28 }
 0x25a   : > { %4135 = vmatprep.subr.bf16.mxu1 %v4471_v26 }
 0x25c   : > { %4088 = vmatmul.mubr.bf16.gmra.mxu1 %v5536_v12 }
 0x25d   : > { %4136 = vmatpush3.bf16.msra.mxu1 %v4471_v26  ;;  %4091 = vmatprep.mubr.bf16.mxu1 %v5577_v53  ;;  %v5906_v53 = vpop.f32.mrf.mxu1 }
 0x25e   : > { %4137 = vmatprep.subr.bf16.mxu1 %v4472_v1 }
 0x25f   : > { %v5910_v43 = vpop.f32.mrf.mxu1 }
 0x261   : > { %4138 = vmatpush3.bf16.msra.mxu1 %v4472_v1 }
 0x262   : > { %4139 = vmatprep.subr.bf16.mxu1 %v4473_v52 }
 0x264   : > { %4092 = vmatmul.mubr.bf16.gmra.mxu1 %v5847_v11 }
 0x265   : > { %4140 = vmatpush3.bf16.msra.mxu1 %v4473_v52  ;;  %4143 = vmatprep.mubr.bf16.mxu1 %v5355_v6  ;;  %v5912_v6 = vpop.f32.mrf.mxu1 }
 0x266   : > { %4141 = vmatprep.subr.bf16.mxu1 %v4474_v5 }
 0x268   : > { %v5915_v7 = vpop.f32.mrf.mxu0 }
 0x269   : > { %4142 = vmatpush3.bf16.msra.mxu1 %v4474_v5 }
 0x26c   : > { %4144 = vmatmul.mubr.bf16.vlgmr.msra.gmra.mxu1 %v5402_v57  ;;  %v1230_v57 = vpop.f32.mrf.mxu1 }
 0x26d   : > { %4147 = vmatprep.mubr.bf16.mxu1 %v5451_v54 }
 0x274   : > { %4148 = vmatmul.mubr.bf16.gmra.mxu1 %v5497_v60  ;;  %v3925_v54 = vpop.f32.mrf.mxu1 }
 0x275   : > { %4151 = vmatprep.mubr.bf16.mxu1 %v5540_v49 }
 0x276   : > { %v1243_v55 = vpop.f32.mrf.mxu1 }
 0x278   : > { %v3926_v60 = vpop.f32.mrf.mxu1 }
 0x27a   : > { %v1246_v12 = vpop.f32.mrf.mxu1 }
 0x27c   : > { %4152 = vmatmul.mubr.bf16.gmra.mxu1 %v5589_v46  ;;  %v5917_v46 = vpop.f32.mrf.mxu0 }
 0x27d   : > { %4155 = vmatprep.mubr.bf16.mxu1 %v5660_v9  ;;  %v4475_v9 = vld [vmem:[%s5112_s9 + $0x38] sm:$0xff]  }
 0x27e   : > { %4191 = vmatprep.subr.bf16.mxu1 %v4475_v9  ;;  %v5920_v40 = vpop.f32.mrf.mxu0 }
 0x27f   : > { %4192 = vmatpush3.bf16.msra.mxu1 %v4475_v9 }
 0x280   : > { %4193 = vmatprep.subr.bf16.mxu1 %v4476_v61  ;;  %v5923_v37 = vpop.f32.mrf.mxu0 }
 0x282   : > { %v5926_v14 = vpop.f32.mrf.mxu0 }
 0x283   : > { %4194 = vmatpush3.bf16.msra.mxu1 %v4476_v61 }
 0x284   : > { %4156 = vmatmul.mubr.bf16.gmra.mxu1 %v5751_v3  ;;  %v4477_v3 = vld [vmem:[%s5112_s9 + $0x28] sm:$0xff]   ;;  %v5929_v31 = vpop.f32.mrf.mxu0  ;;  %s3126_s9 = sadd.s32 %s3643_s10, %s3636_s12 }
 0x285   : > { %4195 = vmatprep.subr.bf16.mxu1 %v4477_v3  ;;  %s3128_s27 = sadd.s32 %s3637_s23, %s3126_s9 }
 0x286   : > { %v5932_v29 = vpop.f32.mrf.mxu0 }
 0x287   : > { %4196 = vmatpush3.bf16.msra.mxu1 %v4477_v3 }
 0x288   : > { %4197 = vmatprep.subr.bf16.mxu1 %v4478_v42  ;;  %v5935_v44 = vpop.f32.mrf.mxu0 }
 0x28b   : > { %4198 = vmatpush3.bf16.msra.mxu1 %v4478_v42 }
 0x28c   : > { %v3929_v49 = vpop.f32.mrf.mxu1  ;;  %4199 = vmatprep.subr.bf16.mxu1 %v4479_v50 }
 0x28e   : > { %v1259_v21 = vpop.f32.mrf.mxu1 }
 0x28f   : > { %4200 = vmatpush3.bf16.msra.mxu1 %v4479_v50 }
 0x290   : > { %v3930_v25 = vpop.f32.mrf.mxu1  ;;  %4201 = vmatprep.subr.bf16.mxu1 %v4480_v51 }
 0x292   : > { %v1262_v19 = vpop.f32.mrf.mxu1 }
 0x293   : > { %4202 = vmatpush3.bf16.msra.mxu1 %v4480_v51 }
 0x294   : > { %4203 = vmatprep.subr.bf16.mxu1 %v4481_v63 }
 0x297   : > { %4204 = vmatpush3.bf16.msra.mxu1 %v4481_v63 }
 0x298   : > { %v5937_v18 = vpop.f32.mrf.mxu0  ;;  %4205 = vmatprep.subr.bf16.mxu1 %v4482_v16 }
 0x29a   : > { %v5940_v56 = vpop.f32.mrf.mxu0 }
 0x29b   : > { %4206 = vmatpush3.bf16.msra.mxu1 %v4482_v16 }
 0x29c   : > { %v5943_v59 = vpop.f32.mrf.mxu0 }
 0x29e   : > { %v5945_v35 = vpop.f32.mrf.mxu0 }
 0x29f   : > { %6561 = vst [vmem:[#allocation35_spill] sm:$0xff] %v5945_v35 }
 0x2a4   : > { %v3933_v8 = vpop.f32.mrf.mxu1 }
 0x2a6   : > { %v1275_v24 = vpop.f32.mrf.mxu1 }
 0x2a8   : > { %v3934_v38 = vpop.f32.mrf.mxu1 }
 0x2aa   : > { %v1278_v45 = vpop.f32.mrf.mxu1 }
 0x2ac   : > { %v3953_v0 = vpop.f32.mrf.mxu1 }
 0x2ae   : > { %v1372_v41 = vpop.f32.mrf.mxu1 }
 0x2b0   : > { %v3954_v62 = vpop.f32.mrf.mxu1  ;;  %v5947_v4 = vpop.f32.mrf.mxu0 }
 0x2b2   : > { %v1375_v36 = vpop.f32.mrf.mxu1  ;;  %v5949_v26 = vpop.f32.mrf.mxu0 }
 0x2b3   : > { %v1376_v34 = vadd.f32 %v1375_v36, %v1230_v57  ;;  %6562 = vst [vmem:[#allocation36_spill] sm:$0xff] %v5949_v26 }
 0x2b4   : > { %v3957_v30 = vpop.f32.mrf.mxu1 }
 0x2b5   : > { %v1397_v33 = vadd.f32 %v3957_v30, %v3925_v54  ;;  %v5951_v54 = vpop.f32.mrf.mxu0 }
 0x2b6   : > { %v1388_v23 = vpop.f32.mrf.mxu1  ;;  %6563 = vst [vmem:[#allocation37_spill] sm:$0xff] %v5951_v54 }
 0x2b7   : > { %v1389_v22 = vadd.f32 %v1388_v23, %v1243_v55 }
 0x2b8   : > { %v3958_v13 = vpop.f32.mrf.mxu1 }
 0x2b9   : > { %v1400_v2 = vadd.f32 %v3958_v13, %v3926_v60  ;;  %v1381_v60 = vadd.f32 %v3953_v0, %v5906_v53 }
 0x2ba   : > { %v1391_v11 = vpop.f32.mrf.mxu1 }
 0x2bb   : > { %v1392_v20 = vadd.f32 %v1391_v11, %v1246_v12 }
 0x2bc   : > { %v3961_v39 = vpop.f32.mrf.mxu1 }
 0x2bd   : > { %v1413_v47 = vadd.f32 %v3961_v39, %v3929_v49 }
 0x2be   : > { %v1404_v58 = vpop.f32.mrf.mxu1 }
 0x2bf   : > { %v1405_v48 = vadd.f32 %v1404_v58, %v1259_v21  ;;  %v1373_v21 = vadd.f32 %v1372_v41, %v5910_v43 }
 0x2c0   : > { %v3962_v17 = vpop.f32.mrf.mxu1 }
 0x2c1   : > { %v1416_v27 = vadd.f32 %v3962_v17, %v3930_v25  ;;  %v5957_v25 = vpop.f32.mrf.mxu0 }
 0x2c2   : > { %v1407_v15 = vpop.f32.mrf.mxu1  ;;  %6564 = vst [vmem:[#allocation38_spill] sm:$0xff] %v5957_v25 }
 0x2c3   : > { %v1408_v10 = vadd.f32 %v1407_v15, %v1262_v19  ;;  %v1384_v19 = vadd.f32 %v3954_v62, %v5912_v6 }
 0x2c4   : > { %v3965_v32 = vpop.f32.mrf.mxu1 }
 0x2c5   : > { %v1429_v28 = vadd.f32 %v3965_v32, %v3933_v8 }
 0x2c6   : > { %v1420_v1 = vpop.f32.mrf.mxu1 }
 0x2c7   : > { %v1421_v52 = vadd.f32 %v1420_v1, %v1275_v24 }
 0x2c8   : > { %v3966_v5 = vpop.f32.mrf.mxu1 }
 0x2c9   : > { %v1432_v57 = vadd.f32 %v3966_v5, %v3934_v38  ;;  %v5964_v38 = vpop.f32.mrf.mxu0 }
 0x2ca   : > { %v1423_v55 = vpop.f32.mrf.mxu1 }
 0x2cb   : > { %v1424_v12 = vadd.f32 %v1423_v55, %v1278_v45  ;;  %v5968_v43 = vpop.f32.mrf.mxu0 }
 0x2cc   : > { %v3985_v49 = vpop.f32.mrf.mxu1 }
 0x2cd   : > { %v5955_v9 = vadd.f32 %v3985_v49, %v1381_v60  ;;  %v5974_v6 = vpop.f32.mrf.mxu0 }
 0x2ce   : > { %v1583_v61 = vpop.f32.mrf.mxu1 }
 0x2cf   : > { %v5960_v8 = vadd.f32 %v1583_v61, %v1373_v21  ;;  %v5978_v13 = vpop.f32.mrf.mxu0 }
 0x2d0   : > { %v3986_v3 = vpop.f32.mrf.mxu1 }
 0x2d1   : > { %v5962_v24 = vadd.f32 %v3986_v3, %v1384_v19 }
 0x2d2   : > { %v1586_v42 = vpop.f32.mrf.mxu1 }
 0x2d3   : > { %v5966_v53 = vadd.f32 %v1586_v42, %v1376_v34 }
 0x2d4   : > { %v3989_v45 = vpop.f32.mrf.mxu1 }
 0x2d5   : > { %v1652_v0 = vadd.f32 %v3989_v45, %v1397_v33 }
 0x2d6   : > { %v1599_v50 = vpop.f32.mrf.mxu1 }
 0x2d7   : > { %v5970_v41 = vadd.f32 %v1599_v50, %v1389_v22  ;;  %v5984_v22 = vpop.f32.mrf.mxu0 }
 0x2d8   : > { %v3990_v51 = vpop.f32.mrf.mxu1 }
 0x2d9   : > { %v5972_v36 = vadd.f32 %v3990_v51, %v1400_v2  ;;  %v5988_v15 = vpop.f32.mrf.mxu0 }
 0x2da   : > { %v1602_v62 = vpop.f32.mrf.mxu1 }
 0x2db   : > { %v5976_v30 = vadd.f32 %v1602_v62, %v1392_v20 }
 0x2dc   : > { %v3993_v63 = vpop.f32.mrf.mxu1 }
 0x2dd   : > { %v1656_v23 = vadd.f32 %v3993_v63, %v1413_v47 }
 0x2de   : > { %v1615_v34 = vpop.f32.mrf.mxu1 }
 0x2df   : > { %v5980_v16 = vadd.f32 %v1615_v34, %v1405_v48  ;;  %v5994_v48 = vpop.f32.mrf.mxu0 }
 0x2e0   : > { %v3994_v33 = vpop.f32.mrf.mxu1 }
 0x2e1   : > { %v5982_v11 = vadd.f32 %v3994_v33, %v1416_v27  ;;  %v5998_v60 = vpop.f32.mrf.mxu0 }
 0x2e2   : > { %v1618_v39 = vpop.f32.mrf.mxu1  ;;  %6567 = vst [vmem:[#allocation41_spill] sm:$0xff] %v5998_v60 }
 0x2e3   : > { %v5986_v2 = vadd.f32 %v1618_v39, %v1408_v10  ;;  %v6000_v21 = vpop.f32.mrf.mxu0 }
 0x2e4   : > { %v3997_v58 = vpop.f32.mrf.mxu1  ;;  %6568 = vst [vmem:[#allocation42_spill] sm:$0xff] %v6000_v21 }
 0x2e5   : > { %v1660_v17 = vadd.f32 %v3997_v58, %v1429_v28 }
 0x2e6   : > { %v1631_v20 = vpop.f32.mrf.mxu1 }
 0x2e7   : > { %v5990_v32 = vadd.f32 %v1631_v20, %v1421_v52  ;;  %v6002_v52 = vpop.f32.mrf.mxu0 }
 0x2e8   : > { %v3998_v47 = vpop.f32.mrf.mxu1  ;;  %6569 = vst [vmem:[#allocation43_spill] sm:$0xff] %v6002_v52 }
 0x2e9   : > { %v5992_v1 = vadd.f32 %v3998_v47, %v1432_v57  ;;  %v6007_v45 = vpop.f32.mrf.mxu0 }
 0x2ea   : > { %v1634_v5 = vpop.f32.mrf.mxu1  ;;  %6570 = vst [vmem:[#allocation44_spill] sm:$0xff] %v6007_v45 }
 0x2eb   : > { %6565 = vst [vmem:[#allocation39_spill] sm:$0xff] %v5992_v1  ;;  %v5996_v27 = vadd.f32 %v1634_v5, %v1424_v12  ;;  %v6009_v62 = vpop.f32.mrf.mxu0 }
 0x2ec   : > { %v4017_v55 = vpop.f32.mrf.mxu1  ;;  %6571 = vst [vmem:[#allocation45_spill] sm:$0xff] %v6009_v62 }
 0x2ed   : > { %6566 = vst [vmem:[#allocation40_spill] sm:$0xff] %v5996_v27  ;;  %v6018_v33 = vpop.f32.mrf.mxu0 }
 0x2ee   : > { %v1761_v10 = vpop.f32.mrf.mxu1  ;;  %6572 = vst [vmem:[#allocation46_spill] sm:$0xff] %v6018_v33 }
 0x2ef   : > { %v6022_v20 = vpop.f32.mrf.mxu0  ;;  %v1824_v26 = vadd.f32 %v1761_v10, %v5960_v8 }
 0x2f0   : > { %v4018_v49 = vpop.f32.mrf.mxu1  ;;  %6573 = vst [vmem:[#allocation47_spill] sm:$0xff] %v6022_v20 }
 0x2f1   : > { %v1827_v35 = vadd.f32 %v4018_v49, %v5962_v24 }
 0x2f2   : > { %v1764_v28 = vpop.f32.mrf.mxu1 }
 0x2f3   : > { %v2018_v8 = vadd.f32 %v5920_v40, %v1827_v35 }
 0x2f4   : > { %v4021_v61 = vpop.f32.mrf.mxu1 }
 0x2f5   : > { %v1830_v19 = vadd.f32 %v4021_v61, %v1652_v0  ;;  %v6031_v61 = vpop.f32.mrf.mxu0 }
 0x2f6   : > { %v1777_v3 = vpop.f32.mrf.mxu1  ;;  %6576 = vst [vmem:[#allocation50_spill] sm:$0xff] %v6031_v61 }
 0x2f7   : > { %v6005_v57 = vadd.f32 %v5926_v14, %v1830_v19  ;;  %v1828_v24 = vadd.f32 %v1777_v3, %v5970_v41 }
 0x2f8   : > { %v4022_v42 = vpop.f32.mrf.mxu1 }
 0x2f9   : > { %v2019_v3 = vadd.f32 %v5929_v31, %v1828_v24 }
 0x2fa   : > { %v1780_v12 = vpop.f32.mrf.mxu1 }
 0x2fb   : > { %v1829_v41 = vadd.f32 %v1780_v12, %v5976_v30 }
 0x2fc   : > { %v4025_v50 = vpop.f32.mrf.mxu1 }
 0x2fd   : > { %v1834_v51 = vadd.f32 %v4025_v50, %v1656_v23  ;;  %v6035_v50 = vpop.f32.mrf.mxu0 }
 0x2fe   : > { %v6011_v63 = vpop.f32.mrf.mxu1  ;;  %6578 = vst [vmem:[#allocation52_spill] sm:$0xff] %v6035_v50 }
 0x2ff   : > { %v6014_v34 = vadd.f32 %v5937_v18, %v1834_v51  ;;  %v4177_v25 = vpop.f32.mrf.mxu0  ;;  %v1832_v31 = vadd.f32 %v6011_v63, %v5980_v16 }
 0x300   : > { %v6016_v0 = vpop.f32.mrf.mxu1 }
 0x301   : > { %v2689_v20 = vpop.f32.mrf.mxu0  ;;  %v1835_v30 = vadd.f32 %v6016_v0, %v5982_v11 }
 0x302   : > { %v6020_v39 = vpop.f32.mrf.mxu1 }
 0x303   : > { %v4178_v54 = vpop.f32.mrf.mxu0 }
 0x304   : > { %v4029_v14 = vpop.f32.mrf.mxu1 }
 0x305   : > { %v1838_v58 = vadd.f32 %v4029_v14, %v1660_v17 }
 0x306   : > { %v6024_v47 = vpop.f32.mrf.mxu1 }
 0x307   : > { %v6027_v23 = vadd.f32 %v5947_v4, %v1838_v58 }
 0x308   : > { %v6029_v5 = vpop.f32.mrf.mxu1 }
 0x309   : > { %6574 = vst [vmem:[#allocation48_spill] sm:$0xff] %v6027_v23  ;;  %6575 = vst [vmem:[#allocation49_spill] sm:$0xff] %v6029_v5  ;;  %v2692_v23 = vpop.f32.mrf.mxu0 }
 0x30a   : > { %v6033_v18 = vpop.f32.mrf.mxu1 }
 0x30b   : > { %6577 = vst [vmem:[#allocation51_spill] sm:$0xff] %v6033_v18  ;;  %v1826_v18 = vadd.f32 %v4017_v55, %v5955_v9  ;;  %v6044_v50 = vpop.f32.mrf.mxu0  ;;  %v2015_v55 = vadd.f32 %v5917_v46, %v1824_v26  ;;  %v1831_v26 = vadd.f32 %v4022_v42, %v5972_v36 }
 0x30c   : > { %v4081_v19 = vpop.f32.mrf.mxu1 }
 0x30d   : > { %v2017_v5 = vadd.f32 %v5915_v7, %v1826_v18  ;;  %v6053_v1 = vpop.f32.mrf.mxu0 }
 0x30e   : > { %v2136_v51 = vpop.f32.mrf.mxu1 }
 0x30f   : > { %v2201_v9 = vadd.f32 %v4081_v19, %v2017_v5  ;;  %v6062_v10 = vpop.f32.mrf.mxu0 }
 0x310   : > { %v4082_v33 = vpop.f32.mrf.mxu1 }
 0x311   : > { %v2202_v49 = vadd.f32 %v4082_v33, %v2018_v8  ;;  %v6074_v35 = vpop.f32.mrf.mxu0 }
 0x312   : > { %v2139_v17 = vpop.f32.mrf.mxu1 }
 0x313   : > { %v6084_v36 = vpop.f32.mrf.mxu0 }
 0x314   : > { %v4085_v14 = vpop.f32.mrf.mxu1 }
 0x315   : > { %v2721_v0 = vpop.f32.mrf.mxu0 }
 0x316   : > { %v2152_v62 = vpop.f32.mrf.mxu1 }
 0x317   : > { %v2203_v19 = vadd.f32 %v2152_v62, %v2019_v3 }
 0x318   : > { %v4086_v45 = vpop.f32.mrf.mxu1 }
 0x31a   : > { %v2155_v4 = vpop.f32.mrf.mxu1 }
 0x31c   : > { %v6037_v58 = vpop.f32.mrf.mxu1 }
 0x31e   : > { %v6039_v27 = vpop.f32.mrf.mxu1 }
 0x31f   : > { %6579 = vst [vmem:[#allocation53_spill] sm:$0xff] %v6039_v27 }
 0x320   : > { %v6041_v61 = vpop.f32.mrf.mxu1 }
 0x321   : > { %6580 = vst [vmem:[#allocation54_spill] sm:$0xff] %v6041_v61  ;;  %v1825_v61 = vadd.f32 %v1764_v28, %v5966_v53 }
 0x322   : > { %v6046_v52 = vpop.f32.mrf.mxu1 }
 0x323   : > { %6581 = vst [vmem:[#allocation55_spill] sm:$0xff] %v6046_v52  ;;  %v2199_v52 = vadd.f32 %v2136_v51, %v2015_v55  ;;  %v2016_v18 = vadd.f32 %v5923_v37, %v1825_v61  ;;  %v2380_v61 = vadd.f32 %v5974_v6, %v2202_v49  ;;  %v6081_v51 = vld [vmem:[%s479_s6] ss:$0 sm:$0xff]  ;;  %v2020_v6 = vadd.f32 %v5935_v44, %v1829_v41  ;;  %v6587_v41 = vld [vmem:[#allocation49_spill] sm:$0xff]  ;;  %s4625_s6 = scalar_lea.vmem %s4624_s21, 4096 }
 0x324   : > { %v6049_v21 = vpop.f32.mrf.mxu1  ;;  %v2381_v55 = vadd.f32 %v5988_v15, %v2203_v19  ;;  %v1833_v44 = vadd.f32 %v6020_v39, %v5986_v2  ;;  %p4627_p8 = scmp.lt.s32.totalorder %s4625_s6, %s4619_s19 }
 0x325   : > { %v2200_v28 = vadd.f32 %v2139_v17, %v2016_v18  ;;  %v2377_v40 = vadd.f32 %v5968_v43, %v2199_v52 }
 0x326   : > { %v6055_v27 = vpop.f32.mrf.mxu1  ;;  %p4628_p9 = por %p4627_p8, %p4626_p0 }
 0x327   : > { %6582 = vst [vmem:[#allocation56_spill] sm:$0xff] %v6055_v27  ;;  %v2379_v27 = vadd.f32 %v5964_v38, %v2201_v9  ;;  %v2205_v38 = vadd.f32 %v4085_v14, %v6005_v57  ;;  %v2378_v17 = vadd.f32 %v5978_v13, %v2200_v28  ;;  %v2204_v14 = vadd.f32 %v2155_v4, %v2020_v6 }
 0x328   : > { %v6059_v60 = vpop.f32.mrf.mxu1  ;;  %p4629_p13 = pnand %p4628_p9, %p4622_p2 }
 0x32a   : > { %v6065_v7 = vpop.f32.mrf.mxu1 }
 0x32c   : > { %v4145_v53 = vpop.f32.mrf.mxu1 }
 0x32d   : > { %v2570_v46 = vadd.f32 %v4145_v53, %v2379_v27  ;;  %v6584_v53 = vld [vmem:[#allocation41_spill] sm:$0xff] }
 0x32e   : > { %v2505_v37 = vpop.f32.mrf.mxu1 }
 0x32f   : > { %v2754_v33 = vadd.f32 %v4177_v25, %v2570_v46  ;;  %v2568_v5 = vadd.f32 %v2505_v37, %v2377_v40  ;;  %v2022_v25 = vadd.f32 %v5932_v29, %v1831_v26  ;;  %v4186_v40 = vpop.f32.mrf.mxu0  ;;  %v6586_v26 = vld [vmem:[#allocation39_spill] sm:$0xff] }
 0x330   : > { %v4146_v27 = vpop.f32.mrf.mxu1  ;;  %v1839_v3 = vadd.f32 %v6587_v41, %v6586_v26  ;;  %v6588_v37 = vld [vmem:[#allocation35_spill] sm:$0xff] }
 0x331   : > { %v2752_v43 = vadd.f32 %v2689_v20, %v2568_v5  ;;  %v2571_v52 = vadd.f32 %v4146_v27, %v2380_v61  ;;  %v2777_v42 = vadd.f32 %v6081_v51, %v2754_v33  ;;  %v2383_v20 = vadd.f32 %v5984_v22, %v2205_v38  ;;  %v6589_v33 = vld [vmem:[#allocation54_spill] sm:$0xff] }
 0x332   : > { %v2508_v57 = vpop.f32.mrf.mxu1  ;;  %v2206_v13 = vadd.f32 %v4086_v45, %v2022_v25  ;;  %v2023_v22 = vadd.f32 %v5940_v56, %v1832_v31  ;;  %v2026_v45 = vadd.f32 %v5943_v59, %v1835_v30  ;;  %v2024_v38 = vadd.f32 %v6588_v37, %v1833_v44  ;;  %v6590_v61 = vld [vmem:[#allocation42_spill] sm:$0xff]  ;;  %v6592_v25 = vld [vmem:[#allocation55_spill] sm:$0xff] }
 0x333   : > { %v2755_v12 = vadd.f32 %v4178_v54, %v2571_v52  ;;  %v2569_v62 = vadd.f32 %v2508_v57, %v2378_v17  ;;  %v2775_v16 = vadd.f32 %v6081_v51, %v2752_v43  ;;  %v2209_v54 = vadd.f32 %v6037_v58, %v6014_v34  ;;  %v6585_v58 = vld [vmem:[#allocation53_spill] sm:$0xff]  ;;  %v6591_v43 = vld [vmem:[#allocation36_spill] sm:$0xff] }
 0x334   : > { %v4149_v9 = vpop.f32.mrf.mxu1  ;;  %v2793_v8 = vmax.f32 %v2777_v42, 0.0  ;;  %v2384_v2 = vadd.f32 %v5994_v48, %v2206_v13  ;;  %v2382_v34 = vadd.f32 %v6584_v53, %v2204_v14  ;;  %v2207_v56 = vadd.f32 %v6585_v58, %v2023_v22  ;;  %v6593_v42 = vld [vmem:[#allocation43_spill] sm:$0xff] }
 0x335   : > { %v2778_v11 = vadd.f32 %v6081_v51, %v2755_v12  ;;  %v2753_v63 = vadd.f32 %v2692_v23, %v2569_v62  ;;  %v2574_v29 = vadd.f32 %v4149_v9, %v2383_v20  ;;  %v1836_v23 = vadd.f32 %v6024_v47, %v5990_v32  ;;  %v2724_v62 = vpop.f32.mrf.mxu0  ;;  %v6594_v20 = vld [vmem:[#allocation40_spill] sm:$0xff]  ;;  %v6595_v13 = vld [vmem:[#allocation51_spill] sm:$0xff]  ;;  %v6596_v9 = vld [vmem:[#allocation37_spill] sm:$0xff] }
 0x336   : > { %v2521_v4 = vpop.f32.mrf.mxu1  ;;  %v2791_v28 = vmax.f32 %v2775_v16, 0.0  ;;  %v2210_v48 = vadd.f32 %v6589_v33, %v2026_v45  ;;  %v2387_v19 = vadd.f32 %v6590_v61, %v2209_v54  ;;  %v2208_v6 = vadd.f32 %v6592_v25, %v2024_v38  ;;  %v6598_v54 = vld [vmem:[#allocation44_spill] sm:$0xff] }
 0x337   : > { %v2794_v15 = vmax.f32 %v2778_v11, 0.0  ;;  %v2776_v24 = vadd.f32 %v6081_v51, %v2753_v63  ;;  %v2572_v49 = vadd.f32 %v2521_v4, %v2381_v55  ;;  %v2758_v18 = vadd.f32 %v6044_v50, %v2574_v29  ;;  %v6597_v63 = vld [vmem:[#allocation48_spill] sm:$0xff]  ;;  %v4189_v45 = vpop.f32.mrf.mxu0 }
 0x338   : > { %v4150_v39 = vpop.f32.mrf.mxu1  ;;  %v2027_v52 = vadd.f32 %v6591_v43, %v1836_v23  ;;  %v2385_v12 = vadd.f32 %v6593_v42, %v2207_v56  ;;  %v1837_v14 = vadd.f32 %v6595_v13, %v6594_v20  ;;  %v2030_v55 = vadd.f32 %v6596_v9, %v1839_v3  ;;  %v6599_v4 = vld [vmem:[#allocation56_spill] sm:$0xff]  ;;  %v6602_v3 = vld [vmem:[#allocation46_spill] sm:$0xff] }
 0x339   : > { %v2808_v59 = vpack.c.bf16 %v2794_v15, %v2793_v8  ;;  %v2792_v46 = vmax.f32 %v2776_v24, 0.0  ;;  %v2756_v32 = vadd.f32 %v6053_v1, %v2572_v49  ;;  %v2575_v47 = vadd.f32 %v4150_v39, %v2384_v2  ;;  %v6600_v39 = vld [vmem:[#allocation45_spill] sm:$0xff]  ;;  %v2737_v38 = vpop.f32.mrf.mxu0  ;;  %v6605_v42 = vld [vmem:[#allocation52_spill] sm:$0xff] }
 0x33a   : > { %v2524_v50 = vpop.f32.mrf.mxu1  ;;  %v2781_v17 = vadd.f32 %v6081_v51, %v2758_v18  ;;  %v2213_v29 = vadd.f32 %v6049_v21, %v6597_v63  ;;  %v2388_v22 = vadd.f32 %v6598_v54, %v2210_v48  ;;  %v2211_v8 = vadd.f32 %v6599_v4, %v2027_v52 }
 0x33b   : > { %v2573_v5 = vadd.f32 %v2524_v50, %v2382_v34  ;;  %v2807_v27 = vpack.c.bf16 %v2792_v46, %v2791_v28  ;;  %v2759_v31 = vadd.f32 %v6062_v10, %v2575_v47  ;;  %v2779_v16 = vadd.f32 %v6081_v51, %v2756_v32  ;;  %v6603_v50 = vld [vmem:[#allocation47_spill] sm:$0xff] }
 0x33c   : > { %v4153_v30 = vpop.f32.mrf.mxu1  ;;  %v2797_v15 = vmax.f32 %v2781_v17, 0.0  ;;  %v2386_v53 = vadd.f32 %v6600_v39, %v2208_v6  ;;  %v2214_v34 = vadd.f32 %v6059_v60, %v2030_v55  ;;  %v2391_v37 = vadd.f32 %v6602_v3, %v2213_v29 }
 0x33d   : > { %v2757_v57 = vadd.f32 %v6074_v35, %v2573_v5  ;;  %v2578_v1 = vadd.f32 %v4153_v30, %v2387_v19  ;;  %4207 = vmatprep.mubr.bf16.mxu1 %v2807_v27  ;;  %v2782_v11 = vadd.f32 %v6081_v51, %v2759_v31  ;;  %v2795_v21 = vmax.f32 %v2779_v16, 0.0  ;;  %v6604_v19 = vld [vmem:[#allocation50_spill] sm:$0xff]  ;;  %v4190_v30 = vpop.f32.mrf.mxu0 }
 0x33e   : > { %v2537_v10 = vpop.f32.mrf.mxu1  ;;  %4208 = vmatmul.mubr.bf16.vlgmr.msra.gmra.mxu1 %v2808_v59  ;;  %v6601_v59 = vld [vmem:[#allocation38_spill] sm:$0xff]  ;;  %v2389_v33 = vadd.f32 %v6603_v50, %v2211_v8  ;;  %v2392_v27 = vadd.f32 %v6604_v19, %v2214_v34  ;;  %v4487_v34 = vld [vmem:[%s5136_s7 + $0x40] sm:$0xff]  ;;  %v4493_v50 = vld [vmem:[%s5136_s7 + $0x70] sm:$0xff] }
 0x33f   : > { %v2780_v35 = vadd.f32 %v6081_v51, %v2757_v57  ;;  %v2576_v44 = vadd.f32 %v2537_v10, %v2385_v12  ;;  %v2798_v24 = vmax.f32 %v2782_v11, 0.0  ;;  %v2762_v49 = vadd.f32 %v6084_v36, %v2578_v1  ;;  %v2740_v16 = vpop.f32.mrf.mxu0  ;;  %v4496_v19 = vld [vmem:[%s5136_s7 + $0x98] sm:$0xff] }
 0x340   : > { %v4154_v23 = vpop.f32.mrf.mxu1  ;;  %v2028_v46 = vadd.f32 %v6601_v59, %v1837_v14  ;;  %v4489_v59 = vld [vmem:[%s5136_s7 + $0x60] sm:$0xff] }
 0x341   : > { %v2796_v18 = vmax.f32 %v2780_v35, 0.0  ;;  %v2579_v2 = vadd.f32 %v4154_v23, %v2388_v22  ;;  %v2760_v58 = vadd.f32 %v2721_v0, %v2576_v44  ;;  %v2810_v28 = vpack.c.bf16 %v2798_v24, %v2797_v15  ;;  %v4483_v15 = vld [vmem:[%s5136_s7 + $0x30] sm:$0xff] }
 0x342   : > { %v2540_v56 = vpop.f32.mrf.mxu1  ;;  %v2785_v36 = vadd.f32 %v6081_v51, %v2762_v49  ;;  %v2212_v48 = vadd.f32 %v6065_v7, %v2028_v46  ;;  %v3013_v24 = vrot.slane %v4483_v15, 1  ;;  %v4484_v49 = vld [vmem:[%s5136_s7 + $0x38] sm:$0xff]  ;;  %v3023_v46 = vrot.slane %v4489_v59, 1  ;;  %v6222_v15 = vld [vmem:[%s482_s26] ss:$0 sm:$0xff] }
 0x343   : > { %v2763_v26 = vadd.f32 %v4186_v40, %v2579_v2  ;;  %v2577_v41 = vadd.f32 %v2540_v56, %v2386_v53  ;;  %v2809_v47 = vpack.c.bf16 %v2796_v18, %v2795_v21  ;;  %v2783_v61 = vadd.f32 %v6081_v51, %v2760_v58  ;;  %v4485_v18 = vld [vmem:[%s5136_s7 + $0x18] sm:$0xff]  ;;  %v4488_v58 = vld [vmem:[%s5136_s7 + $0x28] sm:$0xff] }
 0x344   : > { %v4157_v32 = vpop.f32.mrf.mxu1  ;;  %v2801_v25 = vmax.f32 %v2785_v36, 0.0  ;;  %v2390_v12 = vadd.f32 %v6605_v42, %v2212_v48  ;;  %v3014_v23 = vrot.slane %v4484_v49, 1  ;;  %v3008_v2 = vrot.slane %v4485_v18, 1  ;;  %v4492_v36 = vld [vmem:[%s5136_s7 + $0x50] sm:$0xff] }
 0x345   : > { %v2786_v60 = vadd.f32 %v6081_v51, %v2763_v26  ;;  %v2761_v0 = vadd.f32 %v2724_v62, %v2577_v41  ;;  %v2582_v5 = vadd.f32 %v4157_v32, %v2391_v37  ;;  %4211 = vmatprep.mubr.bf16.mxu1 %v2809_v47  ;;  %v2799_v62 = vmax.f32 %v2783_v61, 0.0  ;;  %v4490_v26 = vld [vmem:[%s5136_s7 + $0x68] sm:$0xff]  ;;  %v4495_v61 = vld [vmem:[%s5136_s7 + $0x90] sm:$0xff] }
 0x346   : > { %v2553_v40 = vpop.f32.mrf.mxu1  ;;  %4212 = vmatmul.mubr.bf16.gmra.mxu1 %v2810_v28  ;;  %v6154_v53 = vsel %vm6606_vm6, %v3013_v24, %v3014_v23  ;;  %v3016_v21 = vrot.slane %v4487_v34, 1  ;;  %v3011_v56 = vrot.slane %v4488_v58, 1  ;;  %v3024_v41 = vrot.slane %v4490_v26, 1  ;;  %v4491_v37 = vld [vmem:[%s5136_s7 + $0x48] sm:$0xff] }
 0x347   : > { %v2802_v43 = vmax.f32 %v2786_v60, 0.0  ;;  %v2784_v52 = vadd.f32 %v6081_v51, %v2761_v0  ;;  %v2766_v17 = vadd.f32 %v4189_v45, %v2582_v5  ;;  %v2580_v31 = vadd.f32 %v2553_v40, %v2389_v33  ;;  %v4494_v60 = vld [vmem:[%s5136_s7 + $0x58] sm:$0xff] }
 0x348   : > { %v4158_v6 = vpop.f32.mrf.mxu1  ;;  %v6162_v3 = vsel %vm6608_vm12, %v3014_v23, %v3016_v21  ;;  %v3019_v32 = vrot.slane %v4492_v36, 1  ;;  %v3026_v33 = vrot.slane %v4493_v50, 1  ;;  %v6169_v48 = vsel %vm6610_vm4, %v3023_v46, %v3024_v41 }
 0x349   : > { %v2800_v7 = vmax.f32 %v2784_v52, 0.0  ;;  %v2764_v57 = vadd.f32 %v2737_v38, %v2580_v31  ;;  %v2583_v1 = vadd.f32 %v4158_v6, %v2392_v27  ;;  %v2812_v13 = vpack.c.bf16 %v2802_v43, %v2801_v25  ;;  %v4497_v52 = vld [vmem:[%s5136_s7 + $0x78] sm:$0xff]  ;;  %v4498_v31 = vld [vmem:[%s5136_s7 + $0x80] sm:$0xff] }
 0x34a   : > { %v2556_v20 = vpop.f32.mrf.mxu1  ;;  %v2789_v14 = vadd.f32 %v6081_v51, %v2766_v17  ;;  %v3018_v38 = vrot.slane %v4491_v37, 1  ;;  %v3021_v0 = vrot.slane %v4494_v60, 1  ;;  %v3033_v40 = vrot.slane %v4495_v61, 1  ;;  %v4499_v6 = vld [vmem:[%s5136_s7 + $0xa0] sm:$0xff] }
 0x34b   : > { %v2767_v9 = vadd.f32 %v4190_v30, %v2583_v1  ;;  %v2581_v55 = vadd.f32 %v2556_v20, %v2390_v12  ;;  %v2811_v11 = vpack.c.bf16 %v2800_v7, %v2799_v62  ;;  %v2787_v10 = vadd.f32 %v6081_v51, %v2764_v57  ;;  %v4500_v1 = vld [vmem:[%s5136_s7 + $0x88] sm:$0xff]  ;;  %v4501_v62 = vld [vmem:[%s5136_s7 + $0xc0] sm:$0xff] }
 0x34c   : > { %v2805_v35 = vmax.f32 %v2789_v14, 0.0  ;;  %v6173_v5 = vsel %vm6611_vm2, %v3018_v38, %v3019_v32  ;;  %v3034_v27 = vrot.slane %v4496_v19, 1  ;;  %v6178_v43 = vsel %vm6612_vm8, %v3024_v41, %v3026_v33 }
 0x34d   : > { %v2790_v63 = vadd.f32 %v6081_v51, %v2767_v9  ;;  %v2765_v29 = vadd.f32 %v2740_v16, %v2581_v55  ;;  %4215 = vmatprep.mubr.bf16.mxu1 %v2811_v11  ;;  %v2803_v22 = vmax.f32 %v2787_v10, 0.0  ;;  %v3028_v17 = vrot.slane %v4497_v52, 1  ;;  %v4503_v55 = vld [vmem:[%s5136_s7 + $0xa8] sm:$0xff]  ;;  %v4504_v11 = vld [vmem:[%s5136_s7 + $0xb0] sm:$0xff] }
 0x34e   : > { %4216 = vmatmul.mubr.bf16.gmra.mxu1 %v2812_v13  ;;  %v3029_v30 = vrot.slane %v4498_v31, 1  ;;  %v6183_v25 = vsel %vm6613_vm15, %v3019_v32, %v3021_v0  ;;  %v3036_v7 = vrot.slane %v4499_v6, 1  ;;  %v6187_v57 = vsel %vm6614_vm1, %v3033_v40, %v3034_v27  ;;  %v4502_v13 = vld [vmem:[%s5136_s7 + $0xc8] sm:$0xff] }
 0x34f   : > { %v2806_v44 = vmax.f32 %v2790_v63, 0.0  ;;  %v2788_v54 = vadd.f32 %v6081_v51, %v2765_v29  ;;  %v4486_v51 = vld [vmem:[%s5136_s7 + $0x20] sm:$0xff]  ;;  %v3031_v42 = vrot.slane %v4500_v1, 1  ;;  %v3043_v20 = vrot.slane %v4501_v62, 1  ;;  %v4505_v29 = vld [vmem:[%s5136_s7 + $0xd0] sm:$0xff] }
 0x350   : > { %v3009_v39 = vrot.slane %v4486_v51, 1  ;;  %v6191_v12 = vsel %vm6615_vm14, %v3028_v17, %v3029_v30  ;;  %v3044_v14 = vrot.slane %v4502_v13, 1  ;;  %v6196_v9 = vsel %vm6616_vm5, %v3034_v27, %v3036_v7 }
 0x351   : > { %v2804_v45 = vmax.f32 %v2788_v54, 0.0  ;;  %v2814_v4 = vpack.c.bf16 %v2806_v44, %v2805_v35  ;;  %v3038_v16 = vrot.slane %v4503_v55, 1  ;;  %v3039_v10 = vrot.slane %v4504_v11, 1  ;;  %v4506_v54 = vld [vmem:[%s5136_s7 + $0xb8] sm:$0xff]  ;;  %s3638_s7 = sshll.u32 %s3128_s27, 7 }
 0x352   : > { %v3010_v28 = vsel %vm6607_vm13, %v3008_v2, %v3009_v39  ;;  %v3012_v47 = vsel %vm6609_vm7, %v3009_v39, %v3011_v56  ;;  %v6201_v63 = vsel %vm6617_vm11, %v3029_v30, %v3031_v42  ;;  %v3046_v35 = vrot.slane %v4505_v29, 1  ;;  %s6279_s30 = scalar_lea.hbm %s6624_s29, %s3638_s7 }
 0x353   : > { %v2813_v8 = vpack.c.bf16 %v2804_v45, %v2803_v22  ;;  %v6205_v44 = vsel %vm6618_vm9, %v3043_v20, %v3044_v14  ;;  %v3041_v22 = vrot.slane %v4506_v54, 1  ;;  %v6209_v45 = vsel %vm6619_vm0, %v3038_v16, %v3039_v10 }
 0x355   : > { %4219 = vmatprep.mubr.bf16.mxu1 %v2813_v8  ;;  %v6215_v8 = vsel %vm6621_vm10, %v3039_v10, %v3041_v22 }
 0x356   : > { %4220 = vmatmul.mubr.bf16.gmra.mxu1 %v2814_v4  ;;  %v6212_v4 = vsel %vm6620_vm3, %v3044_v14, %v3046_v35 }
 0x3fe   : > { %v4209_v24 = vpop.f32.mrf.mxu1 }
 0x3ff   : > { %v2929_v49 = vadd.f32 %v4209_v24, %v6222_v15 }
 0x400   : > { %v2920_v23 = vpop.f32.mrf.mxu1 }
 0x401   : > { %v3066_v18 = vadd.f32 %v6154_v53, %v2929_v49  ;;  %v2921_v2 = vadd.f32 %v6222_v15, %v2920_v23 }
 0x402   : > { %v4210_v51 = vpop.f32.mrf.mxu1 }
 0x403   : > { %v3082_v39 = vmax.f32 %v3066_v18, 0.0  ;;  %v3064_v34 = vadd.f32 %v3010_v28, %v2921_v2  ;;  %v2932_v21 = vadd.f32 %v4210_v51, %v6222_v15 }
 0x404   : > { %v2923_v58 = vpop.f32.mrf.mxu1 }
 0x405   : > { %3098 = vst [vmem:[%s6230_s17 + $0x10] sm:$0xff] %v3082_v39  ;;  %v3080_v56 = vmax.f32 %v3064_v34, 0.0  ;;  %v3067_v59 = vadd.f32 %v6162_v3, %v2932_v21  ;;  %v2924_v53 = vadd.f32 %v6222_v15, %v2923_v58 }
 0x406   : > { %v4213_v28 = vpop.f32.mrf.mxu1 }
 0x407   : > { %3096 = vst [vmem:[%s6230_s17] sm:$0xff] %v3080_v56  ;;  %v3083_v46 = vmax.f32 %v3067_v59, 0.0  ;;  %v3065_v26 = vadd.f32 %v3012_v47, %v2924_v53  ;;  %v2945_v41 = vadd.f32 %v4213_v28, %v6222_v15 }
 0x408   : > { %v2936_v38 = vpop.f32.mrf.mxu1 }
 0x409   : > { %3099 = vst [vmem:[%s6230_s17 + $0x18] sm:$0xff] %v3083_v46  ;;  %v3081_v37 = vmax.f32 %v3065_v26, 0.0  ;;  %v3070_v36 = vadd.f32 %v6169_v48, %v2945_v41  ;;  %v2937_v32 = vadd.f32 %v6222_v15, %v2936_v38 }
 0x40a   : > { %v4214_v3 = vpop.f32.mrf.mxu1 }
 0x40b   : > { %3097 = vst [vmem:[%s6230_s17 + $0x8] sm:$0xff] %v3081_v37  ;;  %v3086_v50 = vmax.f32 %v3070_v36, 0.0  ;;  %v3068_v33 = vadd.f32 %v6173_v5, %v2937_v32  ;;  %v2948_v60 = vadd.f32 %v4214_v3, %v6222_v15 }
 0x40c   : > { %v2939_v47 = vpop.f32.mrf.mxu1 }
 0x40d   : > { %3102 = vst [vmem:[%s6230_s17 + $0x30] sm:$0xff] %v3086_v50  ;;  %v3084_v0 = vmax.f32 %v3068_v33, 0.0  ;;  %v3071_v61 = vadd.f32 %v6178_v43, %v2948_v60  ;;  %v2940_v40 = vadd.f32 %v6222_v15, %v2939_v47 }
 0x40e   : > { %v4217_v19 = vpop.f32.mrf.mxu1 }
 0x40f   : > { %3100 = vst [vmem:[%s6230_s17 + $0x20] sm:$0xff] %v3084_v0  ;;  %v3087_v48 = vmax.f32 %v3071_v61, 0.0  ;;  %v3069_v27 = vadd.f32 %v6183_v25, %v2940_v40  ;;  %v2961_v5 = vadd.f32 %v4217_v19, %v6222_v15 }
 0x410   : > { %v2952_v52 = vpop.f32.mrf.mxu1 }
 0x411   : > { %3103 = vst [vmem:[%s6230_s17 + $0x38] sm:$0xff] %v3087_v48  ;;  %v3085_v17 = vmax.f32 %v3069_v27, 0.0  ;;  %v3074_v31 = vadd.f32 %v6187_v57, %v2961_v5  ;;  %v2953_v43 = vadd.f32 %v6222_v15, %v2952_v52 }
 0x412   : > { %v4218_v30 = vpop.f32.mrf.mxu1 }
 0x413   : > { %3101 = vst [vmem:[%s6230_s17 + $0x28] sm:$0xff] %v3085_v17  ;;  %v3090_v6 = vmax.f32 %v3074_v31, 0.0  ;;  %v3072_v7 = vadd.f32 %v6191_v12, %v2953_v43  ;;  %v2964_v1 = vadd.f32 %v4218_v30, %v6222_v15 }
 0x414   : > { %v2955_v25 = vpop.f32.mrf.mxu1 }
 0x415   : > { %3106 = vst [vmem:[%s6230_s17 + $0x50] sm:$0xff] %v3090_v6  ;;  %v3088_v42 = vmax.f32 %v3072_v7, 0.0  ;;  %v3075_v62 = vadd.f32 %v6196_v9, %v2964_v1  ;;  %v2956_v57 = vadd.f32 %v6222_v15, %v2955_v25 }
 0x416   : > { %v4221_v20 = vpop.f32.mrf.mxu1 }
 0x417   : > { %3104 = vst [vmem:[%s6230_s17 + $0x40] sm:$0xff] %v3088_v42  ;;  %v3091_v13 = vmax.f32 %v3075_v62, 0.0  ;;  %v3073_v14 = vadd.f32 %v6201_v63, %v2956_v57  ;;  %v2977_v12 = vadd.f32 %v4221_v20, %v6222_v15 }
 0x418   : > { %v2968_v55 = vpop.f32.mrf.mxu1 }
 0x419   : > { %3107 = vst [vmem:[%s6230_s17 + $0x58] sm:$0xff] %v3091_v13  ;;  %v3089_v16 = vmax.f32 %v3073_v14, 0.0  ;;  %v3078_v9 = vadd.f32 %v6205_v44, %v2977_v12  ;;  %v2969_v11 = vadd.f32 %v6222_v15, %v2968_v55 }
 0x41a   : > { %v4222_v10 = vpop.f32.mrf.mxu1 }
 0x41b   : > { %3105 = vst [vmem:[%s6230_s17 + $0x48] sm:$0xff] %v3089_v16  ;;  %v3094_v29 = vmax.f32 %v3078_v9, 0.0  ;;  %v3076_v63 = vadd.f32 %v6209_v45, %v2969_v11  ;;  %v2980_v35 = vadd.f32 %v4222_v10, %v6222_v15 }
 0x41c   : > { %v2971_v54 = vpop.f32.mrf.mxu1 }
 0x41d   : > { %3110 = vst [vmem:[%s6230_s17 + $0x70] sm:$0xff] %v3094_v29  ;;  %v3092_v22 = vmax.f32 %v3076_v63, 0.0  ;;  %v3079_v24 = vadd.f32 %v6212_v4, %v2980_v35  ;;  %v2972_v44 = vadd.f32 %v6222_v15, %v2971_v54 }
 0x41f   : > { %3108 = vst [vmem:[%s6230_s17 + $0x60] sm:$0xff] %v3092_v22  ;;  %v3095_v49 = vmax.f32 %v3079_v24, 0.0  ;;  %v3077_v23 = vadd.f32 %v6215_v8, %v2972_v44 }
 0x421   : > { %3111 = vst [vmem:[%s6230_s17 + $0x78] sm:$0xff] %v3095_v49  ;;  %v3093_v45 = vmax.f32 %v3077_v23, 0.0 }
 0x423   : > { %3109 = vst [vmem:[%s6230_s17 + $0x68] sm:$0xff] %v3093_v45 }
 0x424   : > { %4632 = shalt.err (!%p4629_p13)
}
 0x425   : > { %s4633_s1 = scalar_lea.hbm %s6279_s30, 2048  ;;  %s4637_s26 = scalar_lea.hbm %s6625_s4, 16384 }
 0x426   : > { %p4634_p10 = scmp.ne.s32.totalorder %s6279_s30, %s4633_s1  ;;  %p4638_p5 = scmp.lt.s32.totalorder %s6279_s30, %s6625_s4 }
 0x427   : > { %p4639_p7 = scmp.lt.s32.totalorder %s4637_s26, %s4633_s1 }
 0x428   : > { %p4635_p11 = pnand %p4634_p10, %p5030_p6 }
 0x429   : > { %p4640_p1 = por %p4639_p7, %p4638_p5 }
 0x42a   : > { %p4636_p12 = pneg %p4635_p11 }
 0x42c   : > { %p4641_p4 = pnand %p4640_p1, %p4636_p12 }
 0x42e   : > { %4644 = shalt.err (!%p4641_p4)
}
 0x42f   : > { %s4800_s17 = smov 128   ;;  %s4801_s20 = smov 8  }
 0x430   : > { %4238 = dma.vmem_to_hbm [thread:$0]  (%p5030_p6), %s6281_s0, 2048, %s6279_s30, %s6287_s14, %s4800_s17, %s4800_s17, %s4801_s20  }
 0x431 PF: > { %s6626_s10 = sld [smem:[#allocation25_spill]] }
 0x432   : > { %s6627_s12 = sld [smem:[#allocation15_spill]] }
 0x437   : > { %p4258_p2 = scmp.ge.s32.totalorder %s6626_s10, 2 }
 0x438   : > { %s3146_s23 = sand.u32 1, %s6627_s12  }
 0x439   : > { %p4254_p0 = pnand %p4258_p2, %p5034_p3  ;;  %s3147_s27 = scalar_lea.sflag [#allocation4], %s3146_s23 }
 0x43b   : > { %p4255_p8 = pneg %p4254_p0 }
 0x43d   : > { %4722 = dma.done.wait (%p4255_p8), %s3147_s27, 2048  }
 0x43e   : > { %4724 = vsyncadd (%p4255_p8), %s3147_s27, 4294965248  ;;  %s29_s16 = sadd.s32 1, %s6626_s10   ;;  %s6630_s22 = sld [smem:[#allocation16_spill]] }
 0x43f   : > { %p6315_p9 = scmp.ge.s32.totalorder %s29_s16, 10   ;;  %s6631_s26 = sld [smem:[#allocation34_spill]] }
 0x440   : > { %s6632_s27 = sld [smem:[#allocation17_spill]]  ;;  %s6642_s24 = smov %s4731_s25 }
 0x441   : > { %s6633_s28 = sld [smem:[#allocation18_spill]]  ;;  %s6644_s30 = smov %s4755_s8 }
 0x442   : > { %s6634_s29 = sld [smem:[#allocation31_spill]]  ;;  %s6646_s12 = smov %s4783_s15 }
 0x443   : > { %s6635_s0 = sld [smem:[#allocation19_spill]] }
 0x444   : > { %s6636_s9 = sld [smem:[#allocation32_spill]]  ;;  %s6643_s25 = smov %s6630_s22 }
 0x445   : > { %s6637_s10 = sld [smem:[#allocation23_spill]] }
 0x446   : > { %s6638_s11 = sld [smem:[#allocation24_spill]] }
 0x447   : > { %s6639_s13 = sld [smem:[#allocation27_spill]] }
 0x448   : > { %s6640_s14 = sld [smem:[#allocation28_spill]] }
 0x449   : > { %s6641_s19 = sld [smem:[#allocation30_spill]]  ;;  %s6645_s8 = smov %s6635_s0 }
 0x44b   :  { %28 = sbr.rel (!%p6315_p9) target bundleno = 22 (0x16), region = 148 }
 0x44f   : > { %s6647_s15 = smov %s6641_s19 }
 0x450   :  { %3152 = vsyncpa [#allocation3], 1 }
 0x451   :  { %3154 = vsyncpa [#allocation3 + $0x1], 1 }
 0x452   :  { %3155 = vsyncpa [#allocation6], 1 }
 0x453   :  { %3157 = vsyncpa [#allocation6 + $0x1], 1 }
 0x454   :  { %3158 = vsyncpa [#allocation9], 1 }
 0x455   :  { %3160 = vsyncpa [#allocation9 + $0x1], 1 }
 0x456   :  { %3161 = vsyncpa [#allocation4], 1 }
 0x457   :  { %3163 = vsyncpa [#allocation4 + $0x1], 1 }

</bundles_post_ra>
